<compile_context>
chip_gen: v6e
topology: v6e:2x2x1
jax: 0.10.0
libtpu: 0.0.40
codegen_flags: <defaults>
</compile_context>

<pallas_src>
import functools

import jax
import jax.numpy as jnp
from jax.experimental import pallas as pl
from jax.experimental.pallas import tpu as pltpu

OUT_PAD = 128  # lane-dense output width


def mlp_kernel(x_ref,
               w1_ref, b1_ref,
               w2_ref, b2_ref,
               w3_ref, b3_ref,
               w4_ref, b4_ref,
               w5r_ref, b5_ref,
               w6p_ref, b6p_ref,
               o_ref,
               *, compute_dtype):
    """One batch tile of the fused MLP."""

    def dense(h, w_ref, b_ref, relu=True):
        # MXU matmul; optionally bf16 inputs (v6e/v7x), f32 accumulation.
        y = jnp.dot(h.astype(compute_dtype),
                    w_ref[...].astype(compute_dtype),
                    preferred_element_type=jnp.float32) + b_ref[...]
        return jnp.maximum(y, 0.0) if relu else y

    h = dense(x_ref[...], w1_ref, b1_ref)        # (tile, hidden)
    h = dense(h, w2_ref, b2_ref)                 # (tile, hidden)
    h = dense(h, w3_ref, b3_ref)                 # (tile, hidden)
    h4 = dense(h, w4_ref, b4_ref)                # (tile, 5)   (MXU, small N)

    # Layer 5 (5 -> 1) on VPU/XLU: elementwise mul + lane reduce, then ReLU.
    h5 = jnp.maximum(
        jnp.sum(h4 * w5r_ref[...], axis=-1, keepdims=True) + b5_ref[...], 0.0
    )                                            # (tile, 1)

    # Layer 6 (1 -> out) on VPU: broadcast-mul into a lane-dense 128-wide slab.
    o_ref[...] = (h5 * w6p_ref[...] + b6p_ref[...]).astype(o_ref.dtype)


@functools.partial(jax.jit, static_argnames=("batch_tile", "compute_dtype"))
def neural_network_forward(x, params, *, batch_tile=256,
                           compute_dtype=jnp.float32):
    """x: (B, input_size) float32.  params: list of (W[in,out], b[1,out])."""
    B, in_size = x.shape
    (w1, b1), (w2, b2), (w3, b3), (w4, b4), (w5, b5), (w6, b6) = params
    out_size = w6.shape[1]

    # Pad batch so any B works with the performance-optimal tile size.
    n_tiles = pl.cdiv(B, batch_tile)
    Bp = n_tiles * batch_tile
    if Bp != B:
        x = jnp.pad(x, ((0, Bp - B), (0, 0)))

    # Tail-layer params reshaped for the VPU path.
    w5_row = w5.reshape(1, -1)                                  # (1, 5)
    w6_pad = jnp.zeros((1, OUT_PAD), jnp.float32).at[:, :out_size].set(w6)
    b6_pad = jnp.zeros((1, OUT_PAD), jnp.float32).at[:, :out_size].set(b6)

    flat = [x, w1, b1, w2, b2, w3, b3, w4, b4, w5_row, b5, w6_pad, b6_pad]

    # x / output tiled over the batch; all weights replicated (constant block
    # index -> fetched once, no per-step re-DMA).
    in_specs = [pl.BlockSpec((batch_tile, in_size), lambda i: (i, 0))]
    in_specs += [pl.BlockSpec(p.shape, lambda i: (0, 0)) for p in flat[1:]]
    out_spec = pl.BlockSpec((batch_tile, OUT_PAD), lambda i: (i, 0))

    out = pl.pallas_call(
        functools.partial(mlp_kernel, compute_dtype=compute_dtype),
        out_shape=jax.ShapeDtypeStruct((Bp, OUT_PAD), jnp.float32),
        grid=(n_tiles,),
        in_specs=in_specs,
        out_specs=out_spec,
        compiler_params=pltpu.CompilerParams(
            dimension_semantics=("parallel",)),
    )(*flat)

    return out[:B, :out_size]


def init_params(key, input_size, hidden_size, output_size):
    """Deterministic init mirroring the PyTorch layer shapes.

    PyTorch Linear(in, out) has W of shape (out, in); we store W.T = (in, out).
    """
    dims = [
        (input_size, hidden_size),   # hidden_layer1
        (hidden_size, hidden_size),  # hidden_layer2
        (hidden_size, hidden_size),  # hidden_layer3
        (hidden_size, 5),            # hidden_layer4
        (5, 1),                      # hidden_layer5
        (1, output_size),            # output_layer
    ]
    params = []
    for (fan_in, fan_out) in dims:
        key, kw, kb = jax.random.split(key, 3)
        bound = 1.0 / jnp.sqrt(fan_in)
        w = jax.random.uniform(kw, (fan_in, fan_out), jnp.float32, -bound, bound)
        b = jax.random.uniform(kb, (1, fan_out), jnp.float32, -bound, bound)
        params.append((w, b))
    return params


def reference_forward(x, params):
    h = x
    for i, (w, b) in enumerate(params):
        h = h @ w + b
        if i < len(params) - 1:
            h = jnp.maximum(h, 0.0)
    return h


if __name__ == "__main__":
    input_size, hidden_size, output_size = 16, 32, 4
    batch = 512  # with batch_tile=256 -> grid=(2,), sharded across v7x's 2 TCs

    key = jax.random.PRNGKey(0)
    key, kx = jax.random.split(key)
    x = jax.random.normal(kx, (batch, input_size), jnp.float32)
    params = init_params(key, input_size, hidden_size, output_size)

    # Default f32 compute preserves the PyTorch fp32 semantics exactly;
    # pass compute_dtype=jnp.bfloat16 on v6e/v7x for max MXU throughput.
    out = neural_network_forward(x, params)
    out = jax.block_until_ready(out)

    ref = reference_forward(x, params)
    assert out.shape == (batch, output_size)
    assert jnp.allclose(out, ref, atol=1e-5, rtol=1e-5), "mismatch vs reference"

    # Also exercise a non-divisible batch (padded last tile).
    out2 = jax.block_until_ready(
        neural_network_forward(x[:300], params, batch_tile=128))
    assert jnp.allclose(out2, ref[:300], atol=1e-5, rtol=1e-5), "ragged mismatch"

    print("KERNEL_OK")
</pallas_src>

<mosaic_0001>
module attributes {stable_mosaic.version = 11 : i64} {
  func.func @mlp_kernel(%arg0: i32, %arg1: memref<256x16xf32, #tpu.memory_space<vmem>>, %arg2: memref<16x32xf32, #tpu.memory_space<vmem>>, %arg3: memref<1x32xf32, #tpu.memory_space<vmem>>, %arg4: memref<32x32xf32, #tpu.memory_space<vmem>>, %arg5: memref<1x32xf32, #tpu.memory_space<vmem>>, %arg6: memref<32x32xf32, #tpu.memory_space<vmem>>, %arg7: memref<1x32xf32, #tpu.memory_space<vmem>>, %arg8: memref<32x5xf32, #tpu.memory_space<vmem>>, %arg9: memref<1x5xf32, #tpu.memory_space<vmem>>, %arg10: memref<1x5xf32, #tpu.memory_space<vmem>>, %arg11: memref<1x1xf32, #tpu.memory_space<vmem>>, %arg12: memref<1x128xf32, #tpu.memory_space<vmem>>, %arg13: memref<1x128xf32, #tpu.memory_space<vmem>>, %arg14: memref<256x128xf32, #tpu.memory_space<vmem>>) attributes {dimension_semantics = [#tpu.dimension_semantics<parallel>], iteration_bounds = array<i64: 2>, scalar_prefetch = 0 : i64, scratch_operands = 0 : i64, tpu.core_type = #tpu.core_type<tc>, window_params = [{transform_indices = @transform_0, window_bounds = array<i64: 256, 16>}, {pipeline_mode = #tpu.pipeline_mode<synchronous>, transform_indices = @transform_1, window_bounds = array<i64: 16, 32>}, {pipeline_mode = #tpu.pipeline_mode<synchronous>, transform_indices = @transform_2, window_bounds = array<i64: 1, 32>}, {pipeline_mode = #tpu.pipeline_mode<synchronous>, transform_indices = @transform_3, window_bounds = array<i64: 32, 32>}, {pipeline_mode = #tpu.pipeline_mode<synchronous>, transform_indices = @transform_4, window_bounds = array<i64: 1, 32>}, {pipeline_mode = #tpu.pipeline_mode<synchronous>, transform_indices = @transform_5, window_bounds = array<i64: 32, 32>}, {pipeline_mode = #tpu.pipeline_mode<synchronous>, transform_indices = @transform_6, window_bounds = array<i64: 1, 32>}, {pipeline_mode = #tpu.pipeline_mode<synchronous>, transform_indices = @transform_7, window_bounds = array<i64: 32, 5>}, {pipeline_mode = #tpu.pipeline_mode<synchronous>, transform_indices = @transform_8, window_bounds = array<i64: 1, 5>}, {pipeline_mode = #tpu.pipeline_mode<synchronous>, transform_indices = @transform_9, window_bounds = array<i64: 1, 5>}, {pipeline_mode = #tpu.pipeline_mode<synchronous>, transform_indices = @transform_10, window_bounds = array<i64: 1, 1>}, {pipeline_mode = #tpu.pipeline_mode<synchronous>, transform_indices = @transform_11, window_bounds = array<i64: 1, 128>}, {pipeline_mode = #tpu.pipeline_mode<synchronous>, transform_indices = @transform_12, window_bounds = array<i64: 1, 128>}, {transform_indices = @transform_13, window_bounds = array<i64: 256, 128>}]} {
    %c0 = arith.constant 0 : index
    %c0_0 = arith.constant 0 : index
    %0 = vector.load %arg1[%c0, %c0_0] : memref<256x16xf32, #tpu.memory_space<vmem>>, vector<256x16xf32>
    %c0_1 = arith.constant 0 : index
    %c0_2 = arith.constant 0 : index
    %1 = vector.load %arg2[%c0_1, %c0_2] : memref<16x32xf32, #tpu.memory_space<vmem>>, vector<16x32xf32>
    %cst = arith.constant dense<0.000000e+00> : vector<256x32xf32>
    %2 = tpu.matmul %0, %1, %cst {dimension_numbers = #tpu.dot_dimension_numbers<[1], [0], [0], [1], [0, 0, 1, 1], [], []>} : vector<256x16xf32>, vector<16x32xf32>, vector<256x32xf32> -> vector<256x32xf32>
    %c0_3 = arith.constant 0 : index
    %c0_4 = arith.constant 0 : index
    %3 = vector.load %arg3[%c0_3, %c0_4] : memref<1x32xf32, #tpu.memory_space<vmem>>, vector<1x32xf32>
    %4 = vector.broadcast %3 : vector<1x32xf32> to vector<256x32xf32>
    %5 = arith.addf %2, %4 : vector<256x32xf32>
    %cst_5 = arith.constant 0.000000e+00 : f32
    %6 = vector.broadcast %cst_5 : f32 to vector<256x32xf32>
    %7 = arith.maximumf %5, %6 : vector<256x32xf32>
    %c0_6 = arith.constant 0 : index
    %c0_7 = arith.constant 0 : index
    %8 = vector.load %arg4[%c0_6, %c0_7] : memref<32x32xf32, #tpu.memory_space<vmem>>, vector<32x32xf32>
    %cst_8 = arith.constant dense<0.000000e+00> : vector<256x32xf32>
    %9 = tpu.matmul %7, %8, %cst_8 {dimension_numbers = #tpu.dot_dimension_numbers<[1], [0], [0], [1], [0, 0, 1, 1], [], []>} : vector<256x32xf32>, vector<32x32xf32>, vector<256x32xf32> -> vector<256x32xf32>
    %c0_9 = arith.constant 0 : index
    %c0_10 = arith.constant 0 : index
    %10 = vector.load %arg5[%c0_9, %c0_10] : memref<1x32xf32, #tpu.memory_space<vmem>>, vector<1x32xf32>
    %11 = vector.broadcast %10 : vector<1x32xf32> to vector<256x32xf32>
    %12 = arith.addf %9, %11 : vector<256x32xf32>
    %cst_11 = arith.constant 0.000000e+00 : f32
    %13 = vector.broadcast %cst_11 : f32 to vector<256x32xf32>
    %14 = arith.maximumf %12, %13 : vector<256x32xf32>
    %c0_12 = arith.constant 0 : index
    %c0_13 = arith.constant 0 : index
    %15 = vector.load %arg6[%c0_12, %c0_13] : memref<32x32xf32, #tpu.memory_space<vmem>>, vector<32x32xf32>
    %cst_14 = arith.constant dense<0.000000e+00> : vector<256x32xf32>
    %16 = tpu.matmul %14, %15, %cst_14 {dimension_numbers = #tpu.dot_dimension_numbers<[1], [0], [0], [1], [0, 0, 1, 1], [], []>} : vector<256x32xf32>, vector<32x32xf32>, vector<256x32xf32> -> vector<256x32xf32>
    %c0_15 = arith.constant 0 : index
    %c0_16 = arith.constant 0 : index
    %17 = vector.load %arg7[%c0_15, %c0_16] : memref<1x32xf32, #tpu.memory_space<vmem>>, vector<1x32xf32>
    %18 = vector.broadcast %17 : vector<1x32xf32> to vector<256x32xf32>
    %19 = arith.addf %16, %18 : vector<256x32xf32>
    %cst_17 = arith.constant 0.000000e+00 : f32
    %20 = vector.broadcast %cst_17 : f32 to vector<256x32xf32>
    %21 = arith.maximumf %19, %20 : vector<256x32xf32>
    %c0_18 = arith.constant 0 : index
    %c0_19 = arith.constant 0 : index
    %22 = vector.load %arg8[%c0_18, %c0_19] : memref<32x5xf32, #tpu.memory_space<vmem>>, vector<32x5xf32>
    %cst_20 = arith.constant dense<0.000000e+00> : vector<256x5xf32>
    %23 = tpu.matmul %21, %22, %cst_20 {dimension_numbers = #tpu.dot_dimension_numbers<[1], [0], [0], [1], [0, 0, 1, 1], [], []>} : vector<256x32xf32>, vector<32x5xf32>, vector<256x5xf32> -> vector<256x5xf32>
    %c0_21 = arith.constant 0 : index
    %c0_22 = arith.constant 0 : index
    %24 = vector.load %arg9[%c0_21, %c0_22] : memref<1x5xf32, #tpu.memory_space<vmem>>, vector<1x5xf32>
    %25 = vector.broadcast %24 : vector<1x5xf32> to vector<256x5xf32>
    %26 = arith.addf %23, %25 : vector<256x5xf32>
    %cst_23 = arith.constant 0.000000e+00 : f32
    %27 = vector.broadcast %cst_23 : f32 to vector<256x5xf32>
    %28 = arith.maximumf %26, %27 : vector<256x5xf32>
    %c0_24 = arith.constant 0 : index
    %c0_25 = arith.constant 0 : index
    %29 = vector.load %arg10[%c0_24, %c0_25] : memref<1x5xf32, #tpu.memory_space<vmem>>, vector<1x5xf32>
    %30 = vector.broadcast %29 : vector<1x5xf32> to vector<256x5xf32>
    %31 = arith.mulf %28, %30 : vector<256x5xf32>
    %cst_26 = arith.constant dense<0.000000e+00> : vector<256xf32>
    %32 = vector.multi_reduction <add>, %31, %cst_26 [1] : vector<256x5xf32> to vector<256xf32>
    %33 = vector.shape_cast %32 : vector<256xf32> to vector<256x1xf32>
    %c0_27 = arith.constant 0 : index
    %c0_28 = arith.constant 0 : index
    %34 = vector.load %arg11[%c0_27, %c0_28] : memref<1x1xf32, #tpu.memory_space<vmem>>, vector<1x1xf32>
    %35 = vector.broadcast %34 : vector<1x1xf32> to vector<256x1xf32>
    %36 = arith.addf %33, %35 : vector<256x1xf32>
    %cst_29 = arith.constant 0.000000e+00 : f32
    %37 = vector.broadcast %cst_29 : f32 to vector<256x1xf32>
    %38 = arith.maximumf %36, %37 : vector<256x1xf32>
    %c0_30 = arith.constant 0 : index
    %c0_31 = arith.constant 0 : index
    %39 = vector.load %arg12[%c0_30, %c0_31] : memref<1x128xf32, #tpu.memory_space<vmem>>, vector<1x128xf32>
    %40 = vector.broadcast %38 : vector<256x1xf32> to vector<256x128xf32>
    %41 = vector.broadcast %39 : vector<1x128xf32> to vector<256x128xf32>
    %42 = arith.mulf %40, %41 : vector<256x128xf32>
    %c0_32 = arith.constant 0 : index
    %c0_33 = arith.constant 0 : index
    %43 = vector.load %arg13[%c0_32, %c0_33] : memref<1x128xf32, #tpu.memory_space<vmem>>, vector<1x128xf32>
    %44 = vector.broadcast %43 : vector<1x128xf32> to vector<256x128xf32>
    %45 = arith.addf %42, %44 : vector<256x128xf32>
    %c0_34 = arith.constant 0 : index
    %c0_35 = arith.constant 0 : index
    %46 = vector.load %arg14[%c0_34, %c0_35] : memref<256x128xf32, #tpu.memory_space<vmem>>, vector<256x128xf32>
    tpu.vector_store %arg14[%c0_34, %c0_35], %45 {strides = array<i32>} : memref<256x128xf32, #tpu.memory_space<vmem>>, vector<256x128xf32>,
    return
  }
  func.func @transform_0(%arg0: i32) -> (i32, i32) {
    %c0_i32 = arith.constant 0 : i32
    %c0_i32_0 = arith.constant 0 : i32
    return %arg0, %c0_i32 : i32, i32
  }
  func.func @transform_1(%arg0: i32) -> (i32, i32) {
    %c0_i32 = arith.constant 0 : i32
    %c0_i32_0 = arith.constant 0 : i32
    %c0_i32_1 = arith.constant 0 : i32
    return %c0_i32, %c0_i32_0 : i32, i32
  }
  func.func @transform_2(%arg0: i32) -> (i32, i32) {
    %c0_i32 = arith.constant 0 : i32
    %c0_i32_0 = arith.constant 0 : i32
    %c0_i32_1 = arith.constant 0 : i32
    return %c0_i32, %c0_i32_0 : i32, i32
  }
  func.func @transform_3(%arg0: i32) -> (i32, i32) {
    %c0_i32 = arith.constant 0 : i32
    %c0_i32_0 = arith.constant 0 : i32
    %c0_i32_1 = arith.constant 0 : i32
    return %c0_i32, %c0_i32_0 : i32, i32
  }
  func.func @transform_4(%arg0: i32) -> (i32, i32) {
    %c0_i32 = arith.constant 0 : i32
    %c0_i32_0 = arith.constant 0 : i32
    %c0_i32_1 = arith.constant 0 : i32
    return %c0_i32, %c0_i32_0 : i32, i32
  }
  func.func @transform_5(%arg0: i32) -> (i32, i32) {
    %c0_i32 = arith.constant 0 : i32
    %c0_i32_0 = arith.constant 0 : i32
    %c0_i32_1 = arith.constant 0 : i32
    return %c0_i32, %c0_i32_0 : i32, i32
  }
  func.func @transform_6(%arg0: i32) -> (i32, i32) {
    %c0_i32 = arith.constant 0 : i32
    %c0_i32_0 = arith.constant 0 : i32
    %c0_i32_1 = arith.constant 0 : i32
    return %c0_i32, %c0_i32_0 : i32, i32
  }
  func.func @transform_7(%arg0: i32) -> (i32, i32) {
    %c0_i32 = arith.constant 0 : i32
    %c0_i32_0 = arith.constant 0 : i32
    %c0_i32_1 = arith.constant 0 : i32
    return %c0_i32, %c0_i32_0 : i32, i32
  }
  func.func @transform_8(%arg0: i32) -> (i32, i32) {
    %c0_i32 = arith.constant 0 : i32
    %c0_i32_0 = arith.constant 0 : i32
    %c0_i32_1 = arith.constant 0 : i32
    return %c0_i32, %c0_i32_0 : i32, i32
  }
  func.func @transform_9(%arg0: i32) -> (i32, i32) {
    %c0_i32 = arith.constant 0 : i32
    %c0_i32_0 = arith.constant 0 : i32
    %c0_i32_1 = arith.constant 0 : i32
    return %c0_i32, %c0_i32_0 : i32, i32
  }
  func.func @transform_10(%arg0: i32) -> (i32, i32) {
    %c0_i32 = arith.constant 0 : i32
    %c0_i32_0 = arith.constant 0 : i32
    %c0_i32_1 = arith.constant 0 : i32
    return %c0_i32, %c0_i32_0 : i32, i32
  }
  func.func @transform_11(%arg0: i32) -> (i32, i32) {
    %c0_i32 = arith.constant 0 : i32
    %c0_i32_0 = arith.constant 0 : i32
    %c0_i32_1 = arith.constant 0 : i32
    return %c0_i32, %c0_i32_0 : i32, i32
  }
  func.func @transform_12(%arg0: i32) -> (i32, i32) {
    %c0_i32 = arith.constant 0 : i32
    %c0_i32_0 = arith.constant 0 : i32
    %c0_i32_1 = arith.constant 0 : i32
    return %c0_i32, %c0_i32_0 : i32, i32
  }
  func.func @transform_13(%arg0: i32) -> (i32, i32) {
    %c0_i32 = arith.constant 0 : i32
    %c0_i32_0 = arith.constant 0 : i32
    return %arg0, %c0_i32 : i32, i32
  }
}

</mosaic_0001>

<bundles_post_ra>
// kernel: neural_network_forward.1
= control target key start
LH: loop header
LB: loop body
LE: loop exit
PB: predicated region body
PF: predicated region fallthrough
CT: control target
= control target key end

     0   :  { %s3069_s27 = smov 0   ;;  %s3656_s0 = inlined_call_operand.vmem [shape: f32[512,16], index: 0, kind: input, shape index: {}]   ;;  %s3657_s1 = inlined_call_operand.vmem [shape: f32[16,32], index: 1, kind: input, shape index: {}]   ;;  %s3658_s2 = inlined_call_operand.vmem [shape: f32[1,32], index: 2, kind: input, shape index: {}]   ;;  %s3659_s3 = inlined_call_operand.vmem [shape: f32[32,32], index: 3, kind: input, shape index: {}]   ;;  %s3660_s4 = inlined_call_operand.vmem [shape: f32[1,32], index: 4, kind: input, shape index: {}]   ;;  %s3661_s5 = inlined_call_operand.vmem [shape: f32[32,32], index: 5, kind: input, shape index: {}]   ;;  %s3662_s6 = inlined_call_operand.vmem [shape: f32[1,32], index: 6, kind: input, shape index: {}]   ;;  %s3663_s7 = inlined_call_operand.vmem [shape: f32[32,5], index: 7, kind: input, shape index: {}]   ;;  %s3664_s8 = inlined_call_operand.vmem [shape: f32[1,5], index: 8, kind: input, shape index: {}]   ;;  %s3665_s9 = inlined_call_operand.vmem [shape: f32[1,5], index: 9, kind: input, shape index: {}]   ;;  %s3666_s10 = inlined_call_operand.<no memory space> [shape: f32[1,1], index: 10, kind: input, shape index: {}]   ;;  %s3667_s11 = inlined_call_operand.vmem [shape: f32[1,128], index: 11, kind: input, shape index: {}]   ;;  %s3668_s12 = inlined_call_operand.vmem [shape: f32[1,128], index: 12, kind: input, shape index: {}]   ;;  %s3669_s13 = inlined_call_operand.vmem [shape: f32[512,128], index: 13, kind: output, shape index: {}]  }
   0x1   :  { %v18_v0 = vstv %s3666_s10 }
   0x2   :  { %19 = vst [vmem:[#allocation2] sm:$0x1] %v18_v0 }
   0x3 LB: > { %s2467_s28 = sadd.s32 4294967295, %s2993_s27   ;;  %p2471_p0 = scmp.ge.s32.totalorder %s2993_s27, 1  ;;  %s2993_s27 = sphi %s3069_s27, %s25_s27  }
   0x4   : > { %p390_p1 = scmp.lt.s32.totalorder %s2993_s27, 3 }
   0x6   : > { %p391_p2 = pnand %p2471_p0, %p390_p1 }
   0x7   : > { %s2472_s15 = sshll.u32 (!%p391_p2), %s2467_s28, 5 }
   0x8   : > { %394 = sbr.rel (%p391_p2) target bundleno = 1161 (0x489), region = 72  ;;  %p435_p3 = scmp.lt.s32.totalorder (!%p391_p2), %s2472_s15, 63 }
   0xd   : > { %v479_v1 = vld [vmem:[%s3657_s1 + $0x8] sm:$0xff]  ;;  %v478_v2 = vld [vmem:[%s3657_s1] sm:$0xff]  ;;  %s3671_s15 = smov (!%p435_p3, %s2472_s15), 63  ;;  %vm487_vm0 = vcmask 130048   ;;  %v844_v35 = vld [vmem:[%s3659_s3 + $0x18] sm:$0xff]  ;;  %vm852_vm1 = vcmask 261120  }
   0xe   : > { %2756 = vmatprep.subr.mxu0 %v479_v1  ;;  %s2473_s16 = sshll.u32 %s3671_s15, 3  ;;  %2808 = vmatprep.subr.mxu1 %v844_v35  ;;  %v843_v36 = vld [vmem:[%s3659_s3 + $0x10] sm:$0xff]  ;;  %v842_v37 = vld [vmem:[%s3659_s3 + $0x8] sm:$0xff]  ;;  %v841_v38 = vld [vmem:[%s3659_s3] sm:$0xff]  ;;  %vm1973_vm2 = vcmask 39936  }
   0xf   : > { %2757 = vmatpush3.msra.mxu0 %v479_v1  ;;  %s3091_s19 = scalar_lea.vmem %s3656_s0, %s2473_s16  ;;  %2809 = vmatpush3.msra.mxu1 %v844_v35  ;;  %v1209_v39 = vld [vmem:[%s3661_s5 + $0x18] sm:$0xff]  ;;  %v1208_v40 = vld [vmem:[%s3661_s5 + $0x10] sm:$0xff]  ;;  %v1207_v41 = vld [vmem:[%s3661_s5 + $0x8] sm:$0xff]  ;;  %s3556_s10 = scalar_lea.vmem %s3669_s13, %s2473_s16 }
  0x10   : > { %2758 = vmatprep.subr.mxu0 %v478_v2  ;;  %v446_v3 = vld [vmem:[%s3091_s19] sm:$0xff]  ;;  %v447_v4 = vld [vmem:[%s3091_s19 + $0x8] sm:$0xff]  ;;  %v448_v5 = vld [vmem:[%s3091_s19 + $0x10] sm:$0xff]  ;;  %2810 = vmatprep.subr.mxu1 %v843_v36 }
  0x11   : > { %2759 = vmatpush3.msra.mxu0 %v478_v2  ;;  %2760 = vmatprep.mubr.msk.f32.mxu0 %vm487_vm0, %v446_v3  ;;  %v449_v6 = vld [vmem:[%s3091_s19 + $0x18] sm:$0xff]  ;;  %v450_v7 = vld [vmem:[%s3091_s19 + $0x20] sm:$0xff]  ;;  %v451_v8 = vld [vmem:[%s3091_s19 + $0x28] sm:$0xff] }
  0x12   : > { %2761 = vmatmul.mubr.msk.f32.vlgmr.msra.gmra.mxu0 %vm487_vm0, %v447_v4  ;;  %v452_v9 = vld [vmem:[%s3091_s19 + $0x30] sm:$0xff]  ;;  %v453_v10 = vld [vmem:[%s3091_s19 + $0x38] sm:$0xff]  ;;  %v454_v11 = vld [vmem:[%s3091_s19 + $0x40] sm:$0xff]  ;;  %2811 = vmatpush3.msra.mxu1 %v843_v36 }
  0x13   : > { %2763 = vmatprep.mubr.msk.f32.mxu0 %vm487_vm0, %v448_v5  ;;  %v455_v12 = vld [vmem:[%s3091_s19 + $0x48] sm:$0xff]  ;;  %v456_v13 = vld [vmem:[%s3091_s19 + $0x50] sm:$0xff]  ;;  %v457_v14 = vld [vmem:[%s3091_s19 + $0x58] sm:$0xff]  ;;  %2812 = vmatprep.subr.mxu1 %v842_v37 }
  0x14   : > { %v458_v15 = vld [vmem:[%s3091_s19 + $0x60] sm:$0xff]  ;;  %v459_v16 = vld [vmem:[%s3091_s19 + $0x68] sm:$0xff]  ;;  %v460_v17 = vld [vmem:[%s3091_s19 + $0x70] sm:$0xff]  ;;  %2813 = vmatpush3.msra.mxu1 %v842_v37  ;;  %2864 = vmatprep.subr.mxu0 %v1209_v39 }
  0x15   : > { %v461_v18 = vld [vmem:[%s3091_s19 + $0x78] sm:$0xff]  ;;  %v462_v19 = vld [vmem:[%s3091_s19 + $0x80] sm:$0xff]  ;;  %v463_v20 = vld [vmem:[%s3091_s19 + $0x88] sm:$0xff]  ;;  %2814 = vmatprep.subr.mxu1 %v841_v38  ;;  %2865 = vmatpush3.msra.mxu0 %v1209_v39 }
  0x16   : > { %2764 = vmatmul.mubr.msk.f32.gmra.mxu0 %vm487_vm0, %v449_v6  ;;  %v464_v21 = vld [vmem:[%s3091_s19 + $0x90] sm:$0xff]  ;;  %v465_v22 = vld [vmem:[%s3091_s19 + $0x98] sm:$0xff]  ;;  %v466_v23 = vld [vmem:[%s3091_s19 + $0xa0] sm:$0xff]  ;;  %2815 = vmatpush3.msra.mxu1 %v841_v38 }
  0x17   : > { %2766 = vmatprep.mubr.msk.f32.mxu0 %vm487_vm0, %v450_v7  ;;  %v467_v24 = vld [vmem:[%s3091_s19 + $0xa8] sm:$0xff]  ;;  %v468_v25 = vld [vmem:[%s3091_s19 + $0xb0] sm:$0xff]  ;;  %v469_v26 = vld [vmem:[%s3091_s19 + $0xb8] sm:$0xff]  ;;  %2866 = vmatprep.subr.mxu0 %v1208_v40 }
  0x18   : > { %v470_v27 = vld [vmem:[%s3091_s19 + $0xc0] sm:$0xff]  ;;  %v471_v28 = vld [vmem:[%s3091_s19 + $0xc8] sm:$0xff]  ;;  %v472_v29 = vld [vmem:[%s3091_s19 + $0xd0] sm:$0xff]  ;;  %2867 = vmatpush3.msra.mxu0 %v1208_v40 }
  0x19   : > { %v473_v30 = vld [vmem:[%s3091_s19 + $0xd8] sm:$0xff]  ;;  %v474_v31 = vld [vmem:[%s3091_s19 + $0xe0] sm:$0xff]  ;;  %v475_v32 = vld [vmem:[%s3091_s19 + $0xe8] sm:$0xff]  ;;  %2868 = vmatprep.subr.mxu0 %v1207_v41 }
  0x1a   : > { %2767 = vmatmul.mubr.msk.f32.gmra.mxu0 %vm487_vm0, %v451_v8  ;;  %v476_v33 = vld [vmem:[%s3091_s19 + $0xf0] sm:$0xff]  ;;  %v477_v34 = vld [vmem:[%s3091_s19 + $0xf8] sm:$0xff]  ;;  %v1206_v42 = vld [vmem:[%s3661_s5] sm:$0xff] }
  0x1b   : > { %2769 = vmatprep.mubr.msk.f32.mxu0 %vm487_vm0, %v452_v9  ;;  %2869 = vmatpush3.msra.mxu0 %v1207_v41  ;;  %v3184_v43 = vld [vmem:[%s3658_s2] ss:$0 sm:$0xff] }
  0x1c   : > { %2870 = vmatprep.subr.mxu0 %v1206_v42 }
  0x1d   : > { %2871 = vmatpush3.msra.mxu0 %v1206_v42 }
  0x1e   : > { %2770 = vmatmul.mubr.msk.f32.gmra.mxu0 %vm487_vm0, %v453_v10 }
  0x1f   : > { %2772 = vmatprep.mubr.msk.f32.mxu0 %vm487_vm0, %v454_v11 }
  0x22   : > { %2773 = vmatmul.mubr.msk.f32.gmra.mxu0 %vm487_vm0, %v455_v12 }
  0x23   : > { %2775 = vmatprep.mubr.msk.f32.mxu0 %vm487_vm0, %v456_v13 }
  0x26   : > { %2776 = vmatmul.mubr.msk.f32.gmra.mxu0 %vm487_vm0, %v457_v14 }
  0x27   : > { %2778 = vmatprep.mubr.msk.f32.mxu0 %vm487_vm0, %v458_v15 }
  0x2a   : > { %2779 = vmatmul.mubr.msk.f32.gmra.mxu0 %vm487_vm0, %v459_v16 }
  0x2b   : > { %2781 = vmatprep.mubr.msk.f32.mxu0 %vm487_vm0, %v460_v17 }
  0x2e   : > { %2782 = vmatmul.mubr.msk.f32.gmra.mxu0 %vm487_vm0, %v461_v18 }
  0x2f   : > { %2784 = vmatprep.mubr.msk.f32.mxu0 %vm487_vm0, %v462_v19 }
  0x32   : > { %2785 = vmatmul.mubr.msk.f32.gmra.mxu0 %vm487_vm0, %v463_v20 }
  0x33   : > { %2787 = vmatprep.mubr.msk.f32.mxu0 %vm487_vm0, %v464_v21 }
  0x36   : > { %2788 = vmatmul.mubr.msk.f32.gmra.mxu0 %vm487_vm0, %v465_v22 }
  0x37   : > { %2790 = vmatprep.mubr.msk.f32.mxu0 %vm487_vm0, %v466_v23 }
  0x3a   : > { %2791 = vmatmul.mubr.msk.f32.gmra.mxu0 %vm487_vm0, %v467_v24 }
  0x3b   : > { %2793 = vmatprep.mubr.msk.f32.mxu0 %vm487_vm0, %v468_v25 }
  0x3e   : > { %2794 = vmatmul.mubr.msk.f32.gmra.mxu0 %vm487_vm0, %v469_v26 }
  0x3f   : > { %2796 = vmatprep.mubr.msk.f32.mxu0 %vm487_vm0, %v470_v27 }
  0x42   : > { %2797 = vmatmul.mubr.msk.f32.gmra.mxu0 %vm487_vm0, %v471_v28 }
  0x43   : > { %2799 = vmatprep.mubr.msk.f32.mxu0 %vm487_vm0, %v472_v29 }
  0x46   : > { %2800 = vmatmul.mubr.msk.f32.gmra.mxu0 %vm487_vm0, %v473_v30 }
  0x47   : > { %2802 = vmatprep.mubr.msk.f32.mxu0 %vm487_vm0, %v474_v31 }
  0x4a   : > { %2803 = vmatmul.mubr.msk.f32.gmra.mxu0 %vm487_vm0, %v475_v32 }
  0x4b   : > { %2805 = vmatprep.mubr.msk.f32.mxu0 %vm487_vm0, %v476_v33 }
  0x4e   : > { %2806 = vmatmul.mubr.msk.f32.gmra.mxu0 %vm487_vm0, %v477_v34 }
  0xd2   : > { %v2762_v44 = vpop.f32.mrf.mxu0 }
  0xd3   : > { %v656_v45 = vadd.f32 %v2762_v44, %v3184_v43 }
  0xd4   : > { %v650_v46 = vpop.f32.mrf.mxu0 }
  0xd5   : > { %v651_v47 = vadd.f32 %v3184_v43, %v650_v46  ;;  %v810_v50 = vmax.f32 %v656_v45, 0.0 }
  0xd6   : > { %v2765_v48 = vpop.f32.mrf.mxu0 }
  0xd7   : > { %v809_v49 = vmax.f32 %v651_v47, 0.0  ;;  %v666_v51 = vadd.f32 %v2765_v48, %v3184_v43 }
  0xd8   : > { %v660_v52 = vpop.f32.mrf.mxu0 }
  0xd9   : > { %v661_v53 = vadd.f32 %v3184_v43, %v660_v52  ;;  %2816 = vmatprep.mubr.msk.f32.mxu1 %vm852_vm1, %v809_v49  ;;  %v812_v57 = vmax.f32 %v666_v51, 0.0 }
  0xda   : > { %v2768_v54 = vpop.f32.mrf.mxu0  ;;  %2817 = vmatmul.mubr.msk.f32.vlgmr.msra.gmra.mxu1 %vm852_vm1, %v810_v50 }
  0xdb   : > { %v811_v55 = vmax.f32 %v661_v53, 0.0  ;;  %v676_v56 = vadd.f32 %v2768_v54, %v3184_v43 }
  0xdc   : > { %v670_v58 = vpop.f32.mrf.mxu0 }
  0xdd   : > { %v671_v59 = vadd.f32 %v3184_v43, %v670_v58  ;;  %2819 = vmatprep.mubr.msk.f32.mxu1 %vm852_vm1, %v811_v55  ;;  %v814_v60 = vmax.f32 %v676_v56, 0.0 }
  0xde   : > { %v2771_v61 = vpop.f32.mrf.mxu0  ;;  %2820 = vmatmul.mubr.msk.f32.gmra.mxu1 %vm852_vm1, %v812_v57 }
  0xdf   : > { %v813_v62 = vmax.f32 %v671_v59, 0.0  ;;  %v686_v63 = vadd.f32 %v2771_v61, %v3184_v43 }
  0xe0   : > { %v680_v0 = vpop.f32.mrf.mxu0 }
  0xe1   : > { %v681_v1 = vadd.f32 %v3184_v43, %v680_v0  ;;  %2822 = vmatprep.mubr.msk.f32.mxu1 %vm852_vm1, %v813_v62  ;;  %v816_v2 = vmax.f32 %v686_v63, 0.0 }
  0xe2   : > { %v2774_v3 = vpop.f32.mrf.mxu0  ;;  %2823 = vmatmul.mubr.msk.f32.gmra.mxu1 %vm852_vm1, %v814_v60 }
  0xe3   : > { %v815_v4 = vmax.f32 %v681_v1, 0.0  ;;  %v696_v5 = vadd.f32 %v2774_v3, %v3184_v43 }
  0xe4   : > { %v690_v6 = vpop.f32.mrf.mxu0 }
  0xe5   : > { %v691_v7 = vadd.f32 %v3184_v43, %v690_v6  ;;  %2825 = vmatprep.mubr.msk.f32.mxu1 %vm852_vm1, %v815_v4  ;;  %v818_v8 = vmax.f32 %v696_v5, 0.0 }
  0xe6   : > { %v2777_v9 = vpop.f32.mrf.mxu0  ;;  %2826 = vmatmul.mubr.msk.f32.gmra.mxu1 %vm852_vm1, %v816_v2 }
  0xe7   : > { %v817_v10 = vmax.f32 %v691_v7, 0.0  ;;  %v706_v11 = vadd.f32 %v2777_v9, %v3184_v43 }
  0xe8   : > { %v700_v12 = vpop.f32.mrf.mxu0 }
  0xe9   : > { %v701_v13 = vadd.f32 %v3184_v43, %v700_v12  ;;  %2828 = vmatprep.mubr.msk.f32.mxu1 %vm852_vm1, %v817_v10  ;;  %v820_v14 = vmax.f32 %v706_v11, 0.0 }
  0xea   : > { %v2780_v15 = vpop.f32.mrf.mxu0  ;;  %2829 = vmatmul.mubr.msk.f32.gmra.mxu1 %vm852_vm1, %v818_v8 }
  0xeb   : > { %v819_v16 = vmax.f32 %v701_v13, 0.0  ;;  %v716_v17 = vadd.f32 %v2780_v15, %v3184_v43  ;;  %v1573_v13 = vld [vmem:[%s3663_s7 + $0x18] sm:$0xff]  ;;  %v1570_v15 = vld [vmem:[%s3663_s7] sm:$0xff] }
  0xec   : > { %v710_v18 = vpop.f32.mrf.mxu0  ;;  %2920 = vmatprep.subr.mxu1 %v1573_v13 }
  0xed   : > { %v711_v19 = vadd.f32 %v3184_v43, %v710_v18  ;;  %2831 = vmatprep.mubr.msk.f32.mxu1 %vm852_vm1, %v819_v16  ;;  %v822_v20 = vmax.f32 %v716_v17, 0.0  ;;  %2921 = vmatpush3.msra.mxu1 %v1573_v13  ;;  %v3265_v16 = vld [vmem:[%s3660_s4] ss:$0 sm:$0xff] }
  0xee   : > { %v2783_v21 = vpop.f32.mrf.mxu0  ;;  %2832 = vmatmul.mubr.msk.f32.gmra.mxu1 %vm852_vm1, %v820_v14  ;;  %v1572_v14 = vld [vmem:[%s3663_s7 + $0x10] sm:$0xff] }
  0xef   : > { %v821_v22 = vmax.f32 %v711_v19, 0.0  ;;  %v726_v23 = vadd.f32 %v2783_v21, %v3184_v43  ;;  %2922 = vmatprep.subr.mxu1 %v1572_v14 }
  0xf0   : > { %v720_v24 = vpop.f32.mrf.mxu0  ;;  %2923 = vmatpush3.msra.mxu1 %v1572_v14 }
  0xf1   : > { %v721_v25 = vadd.f32 %v3184_v43, %v720_v24  ;;  %2834 = vmatprep.mubr.msk.f32.mxu1 %vm852_vm1, %v821_v22  ;;  %v824_v26 = vmax.f32 %v726_v23, 0.0 }
  0xf2   : > { %v2786_v27 = vpop.f32.mrf.mxu0  ;;  %2835 = vmatmul.mubr.msk.f32.gmra.mxu1 %vm852_vm1, %v822_v20 }
  0xf3   : > { %v823_v28 = vmax.f32 %v721_v25, 0.0  ;;  %v736_v29 = vadd.f32 %v2786_v27, %v3184_v43 }
  0xf4   : > { %v730_v30 = vpop.f32.mrf.mxu0 }
  0xf5   : > { %v731_v31 = vadd.f32 %v3184_v43, %v730_v30  ;;  %2837 = vmatprep.mubr.msk.f32.mxu1 %vm852_vm1, %v823_v28  ;;  %v826_v32 = vmax.f32 %v736_v29, 0.0 }
  0xf6   : > { %v2789_v33 = vpop.f32.mrf.mxu0  ;;  %2838 = vmatmul.mubr.msk.f32.gmra.mxu1 %vm852_vm1, %v824_v26 }
  0xf7   : > { %v825_v34 = vmax.f32 %v731_v31, 0.0  ;;  %v746_v35 = vadd.f32 %v2789_v33, %v3184_v43 }
  0xf8   : > { %v740_v36 = vpop.f32.mrf.mxu0 }
  0xf9   : > { %v741_v37 = vadd.f32 %v3184_v43, %v740_v36  ;;  %2840 = vmatprep.mubr.msk.f32.mxu1 %vm852_vm1, %v825_v34  ;;  %v828_v38 = vmax.f32 %v746_v35, 0.0 }
  0xfa   : > { %v2792_v39 = vpop.f32.mrf.mxu0  ;;  %2841 = vmatmul.mubr.msk.f32.gmra.mxu1 %vm852_vm1, %v826_v32 }
  0xfb   : > { %v827_v40 = vmax.f32 %v741_v37, 0.0  ;;  %v756_v41 = vadd.f32 %v2792_v39, %v3184_v43 }
  0xfc   : > { %v750_v42 = vpop.f32.mrf.mxu0 }
  0xfd   : > { %v751_v44 = vadd.f32 %v3184_v43, %v750_v42  ;;  %2843 = vmatprep.mubr.msk.f32.mxu1 %vm852_vm1, %v827_v40  ;;  %v830_v45 = vmax.f32 %v756_v41, 0.0 }
  0xfe   : > { %v2795_v46 = vpop.f32.mrf.mxu0  ;;  %2844 = vmatmul.mubr.msk.f32.gmra.mxu1 %vm852_vm1, %v828_v38 }
  0xff   : > { %v829_v47 = vmax.f32 %v751_v44, 0.0  ;;  %v766_v48 = vadd.f32 %v2795_v46, %v3184_v43 }
 0x100   : > { %v760_v49 = vpop.f32.mrf.mxu0 }
 0x101   : > { %v761_v50 = vadd.f32 %v3184_v43, %v760_v49  ;;  %2846 = vmatprep.mubr.msk.f32.mxu1 %vm852_vm1, %v829_v47  ;;  %v832_v51 = vmax.f32 %v766_v48, 0.0 }
 0x102   : > { %v2798_v52 = vpop.f32.mrf.mxu0  ;;  %2847 = vmatmul.mubr.msk.f32.gmra.mxu1 %vm852_vm1, %v830_v45 }
 0x103   : > { %v831_v53 = vmax.f32 %v761_v50, 0.0  ;;  %v776_v54 = vadd.f32 %v2798_v52, %v3184_v43 }
 0x104   : > { %v770_v55 = vpop.f32.mrf.mxu0 }
 0x105   : > { %v771_v56 = vadd.f32 %v3184_v43, %v770_v55  ;;  %2849 = vmatprep.mubr.msk.f32.mxu1 %vm852_vm1, %v831_v53  ;;  %v834_v57 = vmax.f32 %v776_v54, 0.0 }
 0x106   : > { %v2801_v58 = vpop.f32.mrf.mxu0  ;;  %2850 = vmatmul.mubr.msk.f32.gmra.mxu1 %vm852_vm1, %v832_v51 }
 0x107   : > { %v833_v59 = vmax.f32 %v771_v56, 0.0  ;;  %v786_v60 = vadd.f32 %v2801_v58, %v3184_v43 }
 0x108   : > { %v780_v61 = vpop.f32.mrf.mxu0 }
 0x109   : > { %v781_v62 = vadd.f32 %v3184_v43, %v780_v61  ;;  %2852 = vmatprep.mubr.msk.f32.mxu1 %vm852_vm1, %v833_v59  ;;  %v836_v63 = vmax.f32 %v786_v60, 0.0 }
 0x10a   : > { %v2804_v0 = vpop.f32.mrf.mxu0  ;;  %2853 = vmatmul.mubr.msk.f32.gmra.mxu1 %vm852_vm1, %v834_v57 }
 0x10b   : > { %v835_v1 = vmax.f32 %v781_v62, 0.0  ;;  %v796_v2 = vadd.f32 %v2804_v0, %v3184_v43 }
 0x10c   : > { %v790_v3 = vpop.f32.mrf.mxu0 }
 0x10d   : > { %v791_v4 = vadd.f32 %v3184_v43, %v790_v3  ;;  %2855 = vmatprep.mubr.msk.f32.mxu1 %vm852_vm1, %v835_v1  ;;  %v838_v5 = vmax.f32 %v796_v2, 0.0 }
 0x10e   : > { %v2807_v6 = vpop.f32.mrf.mxu0  ;;  %2856 = vmatmul.mubr.msk.f32.gmra.mxu1 %vm852_vm1, %v836_v63 }
 0x10f   : > { %v837_v7 = vmax.f32 %v791_v4, 0.0  ;;  %v806_v8 = vadd.f32 %v2807_v6, %v3184_v43 }
 0x110   : > { %v800_v9 = vpop.f32.mrf.mxu0 }
 0x111   : > { %v801_v10 = vadd.f32 %v3184_v43, %v800_v9  ;;  %2858 = vmatprep.mubr.msk.f32.mxu1 %vm852_vm1, %v837_v7  ;;  %v840_v11 = vmax.f32 %v806_v8, 0.0  ;;  %v1571_v43 = vld [vmem:[%s3663_s7 + $0x8] sm:$0xff] }
 0x112   : > { %2859 = vmatmul.mubr.msk.f32.gmra.mxu1 %vm852_vm1, %v838_v5  ;;  %2924 = vmatprep.subr.mxu1 %v1571_v43 }
 0x113   : > { %v839_v12 = vmax.f32 %v801_v10, 0.0  ;;  %2925 = vmatpush3.msra.mxu1 %v1571_v43 }
 0x114   : > { %2926 = vmatprep.subr.mxu1 %v1570_v15 }
 0x115   : > { %2861 = vmatprep.mubr.msk.f32.mxu1 %vm852_vm1, %v839_v12  ;;  %2927 = vmatpush3.msra.mxu1 %v1570_v15 }
 0x116   : > { %2862 = vmatmul.mubr.msk.f32.gmra.mxu1 %vm852_vm1, %v840_v11 }
 0x19a   : > { %v2818_v17 = vpop.f32.mrf.mxu1 }
 0x19b   : > { %v1021_v18 = vadd.f32 %v2818_v17, %v3265_v16 }
 0x19c   : > { %v1015_v19 = vpop.f32.mrf.mxu1 }
 0x19d   : > { %v1016_v20 = vadd.f32 %v3265_v16, %v1015_v19  ;;  %v1175_v23 = vmax.f32 %v1021_v18, 0.0 }
 0x19e   : > { %v2821_v21 = vpop.f32.mrf.mxu1 }
 0x19f   : > { %v1174_v22 = vmax.f32 %v1016_v20, 0.0  ;;  %v1031_v24 = vadd.f32 %v2821_v21, %v3265_v16 }
 0x1a0   : > { %v1025_v25 = vpop.f32.mrf.mxu1 }
 0x1a1   : > { %v1026_v26 = vadd.f32 %v3265_v16, %v1025_v25  ;;  %2872 = vmatprep.mubr.msk.f32.mxu0 %vm852_vm1, %v1174_v22  ;;  %v1177_v29 = vmax.f32 %v1031_v24, 0.0 }
 0x1a2   : > { %v2824_v27 = vpop.f32.mrf.mxu1  ;;  %2873 = vmatmul.mubr.msk.f32.vlgmr.msra.gmra.mxu0 %vm852_vm1, %v1175_v23 }
 0x1a3   : > { %v1176_v28 = vmax.f32 %v1026_v26, 0.0  ;;  %v1041_v30 = vadd.f32 %v2824_v27, %v3265_v16 }
 0x1a4   : > { %v1035_v31 = vpop.f32.mrf.mxu1 }
 0x1a5   : > { %v1036_v32 = vadd.f32 %v3265_v16, %v1035_v31  ;;  %2875 = vmatprep.mubr.msk.f32.mxu0 %vm852_vm1, %v1176_v28  ;;  %v1179_v36 = vmax.f32 %v1041_v30, 0.0 }
 0x1a6   : > { %v2827_v33 = vpop.f32.mrf.mxu1  ;;  %2876 = vmatmul.mubr.msk.f32.gmra.mxu0 %vm852_vm1, %v1177_v29 }
 0x1a7   : > { %v1178_v34 = vmax.f32 %v1036_v32, 0.0  ;;  %v1051_v35 = vadd.f32 %v2827_v33, %v3265_v16 }
 0x1a8   : > { %v1045_v37 = vpop.f32.mrf.mxu1 }
 0x1a9   : > { %v1046_v38 = vadd.f32 %v3265_v16, %v1045_v37  ;;  %2878 = vmatprep.mubr.msk.f32.mxu0 %vm852_vm1, %v1178_v34  ;;  %v1181_v39 = vmax.f32 %v1051_v35, 0.0 }
 0x1aa   : > { %v2830_v40 = vpop.f32.mrf.mxu1  ;;  %2879 = vmatmul.mubr.msk.f32.gmra.mxu0 %vm852_vm1, %v1179_v36 }
 0x1ab   : > { %v1180_v41 = vmax.f32 %v1046_v38, 0.0  ;;  %v1061_v42 = vadd.f32 %v2830_v40, %v3265_v16 }
 0x1ac   : > { %v1055_v44 = vpop.f32.mrf.mxu1 }
 0x1ad   : > { %v1056_v45 = vadd.f32 %v3265_v16, %v1055_v44  ;;  %2881 = vmatprep.mubr.msk.f32.mxu0 %vm852_vm1, %v1180_v41  ;;  %v1183_v46 = vmax.f32 %v1061_v42, 0.0 }
 0x1ae   : > { %v2833_v47 = vpop.f32.mrf.mxu1  ;;  %2882 = vmatmul.mubr.msk.f32.gmra.mxu0 %vm852_vm1, %v1181_v39 }
 0x1af   : > { %v1182_v48 = vmax.f32 %v1056_v45, 0.0  ;;  %v1071_v49 = vadd.f32 %v2833_v47, %v3265_v16 }
 0x1b0   : > { %v1065_v50 = vpop.f32.mrf.mxu1 }
 0x1b1   : > { %v1066_v51 = vadd.f32 %v3265_v16, %v1065_v50  ;;  %2884 = vmatprep.mubr.msk.f32.mxu0 %vm852_vm1, %v1182_v48  ;;  %v1185_v52 = vmax.f32 %v1071_v49, 0.0 }
 0x1b2   : > { %v2836_v53 = vpop.f32.mrf.mxu1  ;;  %2885 = vmatmul.mubr.msk.f32.gmra.mxu0 %vm852_vm1, %v1183_v46 }
 0x1b3   : > { %v1184_v54 = vmax.f32 %v1066_v51, 0.0  ;;  %v1081_v55 = vadd.f32 %v2836_v53, %v3265_v16  ;;  %v3334_v51 = vld [vmem:[%s3662_s6] ss:$0 sm:$0xff] }
 0x1b4   : > { %v1075_v56 = vpop.f32.mrf.mxu1 }
 0x1b5   : > { %v1076_v57 = vadd.f32 %v3265_v16, %v1075_v56  ;;  %2887 = vmatprep.mubr.msk.f32.mxu0 %vm852_vm1, %v1184_v54  ;;  %v1187_v58 = vmax.f32 %v1081_v55, 0.0 }
 0x1b6   : > { %v2839_v59 = vpop.f32.mrf.mxu1  ;;  %2888 = vmatmul.mubr.msk.f32.gmra.mxu0 %vm852_vm1, %v1185_v52 }
 0x1b7   : > { %v1186_v60 = vmax.f32 %v1076_v57, 0.0  ;;  %v1091_v61 = vadd.f32 %v2839_v59, %v3265_v16 }
 0x1b8   : > { %v1085_v62 = vpop.f32.mrf.mxu1 }
 0x1b9   : > { %v1086_v63 = vadd.f32 %v3265_v16, %v1085_v62  ;;  %2890 = vmatprep.mubr.msk.f32.mxu0 %vm852_vm1, %v1186_v60  ;;  %v1189_v0 = vmax.f32 %v1091_v61, 0.0 }
 0x1ba   : > { %v2842_v1 = vpop.f32.mrf.mxu1  ;;  %2891 = vmatmul.mubr.msk.f32.gmra.mxu0 %vm852_vm1, %v1187_v58 }
 0x1bb   : > { %v1188_v2 = vmax.f32 %v1086_v63, 0.0  ;;  %v1101_v3 = vadd.f32 %v2842_v1, %v3265_v16 }
 0x1bc   : > { %v1095_v4 = vpop.f32.mrf.mxu1 }
 0x1bd   : > { %v1096_v5 = vadd.f32 %v3265_v16, %v1095_v4  ;;  %2893 = vmatprep.mubr.msk.f32.mxu0 %vm852_vm1, %v1188_v2  ;;  %v1191_v6 = vmax.f32 %v1101_v3, 0.0 }
 0x1be   : > { %v2845_v7 = vpop.f32.mrf.mxu1  ;;  %2894 = vmatmul.mubr.msk.f32.gmra.mxu0 %vm852_vm1, %v1189_v0 }
 0x1bf   : > { %v1190_v8 = vmax.f32 %v1096_v5, 0.0  ;;  %v1111_v9 = vadd.f32 %v2845_v7, %v3265_v16 }
 0x1c0   : > { %v1105_v10 = vpop.f32.mrf.mxu1 }
 0x1c1   : > { %v1106_v11 = vadd.f32 %v3265_v16, %v1105_v10  ;;  %2896 = vmatprep.mubr.msk.f32.mxu0 %vm852_vm1, %v1190_v8  ;;  %v1193_v12 = vmax.f32 %v1111_v9, 0.0 }
 0x1c2   : > { %v2848_v13 = vpop.f32.mrf.mxu1  ;;  %2897 = vmatmul.mubr.msk.f32.gmra.mxu0 %vm852_vm1, %v1191_v6 }
 0x1c3   : > { %v1192_v14 = vmax.f32 %v1106_v11, 0.0  ;;  %v1121_v43 = vadd.f32 %v2848_v13, %v3265_v16 }
 0x1c4   : > { %v1115_v15 = vpop.f32.mrf.mxu1 }
 0x1c5   : > { %v1116_v17 = vadd.f32 %v3265_v16, %v1115_v15  ;;  %2899 = vmatprep.mubr.msk.f32.mxu0 %vm852_vm1, %v1192_v14  ;;  %v1195_v18 = vmax.f32 %v1121_v43, 0.0 }
 0x1c6   : > { %v2851_v19 = vpop.f32.mrf.mxu1  ;;  %2900 = vmatmul.mubr.msk.f32.gmra.mxu0 %vm852_vm1, %v1193_v12 }
 0x1c7   : > { %v1194_v20 = vmax.f32 %v1116_v17, 0.0  ;;  %v1131_v21 = vadd.f32 %v2851_v19, %v3265_v16 }
 0x1c8   : > { %v1125_v22 = vpop.f32.mrf.mxu1 }
 0x1c9   : > { %v1126_v23 = vadd.f32 %v3265_v16, %v1125_v22  ;;  %2902 = vmatprep.mubr.msk.f32.mxu0 %vm852_vm1, %v1194_v20  ;;  %v1197_v24 = vmax.f32 %v1131_v21, 0.0 }
 0x1ca   : > { %v2854_v25 = vpop.f32.mrf.mxu1  ;;  %2903 = vmatmul.mubr.msk.f32.gmra.mxu0 %vm852_vm1, %v1195_v18 }
 0x1cb   : > { %v1196_v26 = vmax.f32 %v1126_v23, 0.0  ;;  %v1141_v27 = vadd.f32 %v2854_v25, %v3265_v16 }
 0x1cc   : > { %v1135_v28 = vpop.f32.mrf.mxu1 }
 0x1cd   : > { %v1136_v29 = vadd.f32 %v3265_v16, %v1135_v28  ;;  %2905 = vmatprep.mubr.msk.f32.mxu0 %vm852_vm1, %v1196_v26  ;;  %v1199_v30 = vmax.f32 %v1141_v27, 0.0 }
 0x1ce   : > { %v2857_v31 = vpop.f32.mrf.mxu1  ;;  %2906 = vmatmul.mubr.msk.f32.gmra.mxu0 %vm852_vm1, %v1197_v24 }
 0x1cf   : > { %v1198_v32 = vmax.f32 %v1136_v29, 0.0  ;;  %v1151_v33 = vadd.f32 %v2857_v31, %v3265_v16 }
 0x1d0   : > { %v1145_v34 = vpop.f32.mrf.mxu1 }
 0x1d1   : > { %v1146_v35 = vadd.f32 %v3265_v16, %v1145_v34  ;;  %2908 = vmatprep.mubr.msk.f32.mxu0 %vm852_vm1, %v1198_v32  ;;  %v1201_v36 = vmax.f32 %v1151_v33, 0.0 }
 0x1d2   : > { %v2860_v37 = vpop.f32.mrf.mxu1  ;;  %2909 = vmatmul.mubr.msk.f32.gmra.mxu0 %vm852_vm1, %v1199_v30 }
 0x1d3   : > { %v1200_v38 = vmax.f32 %v1146_v35, 0.0  ;;  %v1161_v39 = vadd.f32 %v2860_v37, %v3265_v16 }
 0x1d4   : > { %v1155_v40 = vpop.f32.mrf.mxu1 }
 0x1d5   : > { %v1156_v41 = vadd.f32 %v3265_v16, %v1155_v40  ;;  %2911 = vmatprep.mubr.msk.f32.mxu0 %vm852_vm1, %v1200_v38  ;;  %v1203_v42 = vmax.f32 %v1161_v39, 0.0 }
 0x1d6   : > { %v2863_v44 = vpop.f32.mrf.mxu1  ;;  %2912 = vmatmul.mubr.msk.f32.gmra.mxu0 %vm852_vm1, %v1201_v36 }
 0x1d7   : > { %v1202_v45 = vmax.f32 %v1156_v41, 0.0  ;;  %v1171_v46 = vadd.f32 %v2863_v44, %v3265_v16 }
 0x1d8   : > { %v1165_v47 = vpop.f32.mrf.mxu1 }
 0x1d9   : > { %v1166_v48 = vadd.f32 %v3265_v16, %v1165_v47  ;;  %2914 = vmatprep.mubr.msk.f32.mxu0 %vm852_vm1, %v1202_v45  ;;  %v1205_v49 = vmax.f32 %v1171_v46, 0.0 }
 0x1da   : > { %2915 = vmatmul.mubr.msk.f32.gmra.mxu0 %vm852_vm1, %v1203_v42 }
 0x1db   : > { %v1204_v50 = vmax.f32 %v1166_v48, 0.0 }
 0x1dd   : > { %2917 = vmatprep.mubr.msk.f32.mxu0 %vm852_vm1, %v1204_v50 }
 0x1de   : > { %2918 = vmatmul.mubr.msk.f32.gmra.mxu0 %vm852_vm1, %v1205_v49 }
 0x262   : > { %v2874_v52 = vpop.f32.mrf.mxu0 }
 0x263   : > { %v1385_v53 = vadd.f32 %v2874_v52, %v3334_v51 }
 0x264   : > { %v1379_v54 = vpop.f32.mrf.mxu0 }
 0x265   : > { %v1380_v16 = vadd.f32 %v3334_v51, %v1379_v54  ;;  %v1539_v57 = vmax.f32 %v1385_v53, 0.0 }
 0x266   : > { %v2877_v55 = vpop.f32.mrf.mxu0 }
 0x267   : > { %v1538_v56 = vmax.f32 %v1380_v16, 0.0  ;;  %v1395_v58 = vadd.f32 %v2877_v55, %v3334_v51 }
 0x268   : > { %v1389_v59 = vpop.f32.mrf.mxu0 }
 0x269   : > { %v1390_v60 = vadd.f32 %v3334_v51, %v1389_v59  ;;  %2928 = vmatprep.mubr.msk.f32.mxu1 %vm852_vm1, %v1538_v56  ;;  %v1541_v63 = vmax.f32 %v1395_v58, 0.0 }
 0x26a   : > { %v2880_v61 = vpop.f32.mrf.mxu0  ;;  %2929 = vmatmul.mubr.msk.f32.vlgmr.msra.gmra.mxu1 %vm852_vm1, %v1539_v57 }
 0x26b   : > { %v1540_v62 = vmax.f32 %v1390_v60, 0.0  ;;  %v1405_v0 = vadd.f32 %v2880_v61, %v3334_v51 }
 0x26c   : > { %v1399_v1 = vpop.f32.mrf.mxu0 }
 0x26d   : > { %v1400_v2 = vadd.f32 %v3334_v51, %v1399_v1  ;;  %2931 = vmatprep.mubr.msk.f32.mxu1 %vm852_vm1, %v1540_v62  ;;  %v1543_v6 = vmax.f32 %v1405_v0, 0.0 }
 0x26e   : > { %v2883_v3 = vpop.f32.mrf.mxu0  ;;  %2932 = vmatmul.mubr.msk.f32.gmra.mxu1 %vm852_vm1, %v1541_v63 }
 0x26f   : > { %v1542_v4 = vmax.f32 %v1400_v2, 0.0  ;;  %v1415_v5 = vadd.f32 %v2883_v3, %v3334_v51 }
 0x270   : > { %v1409_v7 = vpop.f32.mrf.mxu0 }
 0x271   : > { %v1410_v8 = vadd.f32 %v3334_v51, %v1409_v7  ;;  %2934 = vmatprep.mubr.msk.f32.mxu1 %vm852_vm1, %v1542_v4  ;;  %v1545_v9 = vmax.f32 %v1415_v5, 0.0 }
 0x272   : > { %v2886_v10 = vpop.f32.mrf.mxu0  ;;  %2935 = vmatmul.mubr.msk.f32.gmra.mxu1 %vm852_vm1, %v1543_v6 }
 0x273   : > { %v1544_v11 = vmax.f32 %v1410_v8, 0.0  ;;  %v1425_v12 = vadd.f32 %v2886_v10, %v3334_v51 }
 0x274   : > { %v1419_v13 = vpop.f32.mrf.mxu0 }
 0x275   : > { %v1420_v14 = vadd.f32 %v3334_v51, %v1419_v13  ;;  %2937 = vmatprep.mubr.msk.f32.mxu1 %vm852_vm1, %v1544_v11  ;;  %v1547_v43 = vmax.f32 %v1425_v12, 0.0 }
 0x276   : > { %v2889_v15 = vpop.f32.mrf.mxu0  ;;  %2938 = vmatmul.mubr.msk.f32.gmra.mxu1 %vm852_vm1, %v1545_v9 }
 0x277   : > { %v1546_v17 = vmax.f32 %v1420_v14, 0.0  ;;  %v1435_v18 = vadd.f32 %v2889_v15, %v3334_v51 }
 0x278   : > { %v1429_v19 = vpop.f32.mrf.mxu0 }
 0x279   : > { %v1430_v20 = vadd.f32 %v3334_v51, %v1429_v19  ;;  %2940 = vmatprep.mubr.msk.f32.mxu1 %vm852_vm1, %v1546_v17  ;;  %v1549_v21 = vmax.f32 %v1435_v18, 0.0 }
 0x27a   : > { %v2892_v22 = vpop.f32.mrf.mxu0  ;;  %2941 = vmatmul.mubr.msk.f32.gmra.mxu1 %vm852_vm1, %v1547_v43 }
 0x27b   : > { %v1548_v23 = vmax.f32 %v1430_v20, 0.0  ;;  %v1445_v24 = vadd.f32 %v2892_v22, %v3334_v51  ;;  %v3403_v20 = vld [vmem:[%s3664_s8] ss:$0 sm:$0xff] }
 0x27c   : > { %v1439_v25 = vpop.f32.mrf.mxu0 }
 0x27d   : > { %v1440_v26 = vadd.f32 %v3334_v51, %v1439_v25  ;;  %2943 = vmatprep.mubr.msk.f32.mxu1 %vm852_vm1, %v1548_v23  ;;  %v1551_v27 = vmax.f32 %v1445_v24, 0.0 }
 0x27e   : > { %v2895_v28 = vpop.f32.mrf.mxu0  ;;  %2944 = vmatmul.mubr.msk.f32.gmra.mxu1 %vm852_vm1, %v1549_v21 }
 0x27f   : > { %v1550_v29 = vmax.f32 %v1440_v26, 0.0  ;;  %v1455_v30 = vadd.f32 %v2895_v28, %v3334_v51 }
 0x280   : > { %v1449_v31 = vpop.f32.mrf.mxu0 }
 0x281   : > { %v1450_v32 = vadd.f32 %v3334_v51, %v1449_v31  ;;  %2946 = vmatprep.mubr.msk.f32.mxu1 %vm852_vm1, %v1550_v29  ;;  %v1553_v33 = vmax.f32 %v1455_v30, 0.0 }
 0x282   : > { %v2898_v34 = vpop.f32.mrf.mxu0  ;;  %2947 = vmatmul.mubr.msk.f32.gmra.mxu1 %vm852_vm1, %v1551_v27 }
 0x283   : > { %v1552_v35 = vmax.f32 %v1450_v32, 0.0  ;;  %v1465_v36 = vadd.f32 %v2898_v34, %v3334_v51 }
 0x284   : > { %v1459_v37 = vpop.f32.mrf.mxu0 }
 0x285   : > { %v1460_v38 = vadd.f32 %v3334_v51, %v1459_v37  ;;  %2949 = vmatprep.mubr.msk.f32.mxu1 %vm852_vm1, %v1552_v35  ;;  %v1555_v39 = vmax.f32 %v1465_v36, 0.0 }
 0x286   : > { %v2901_v40 = vpop.f32.mrf.mxu0  ;;  %2950 = vmatmul.mubr.msk.f32.gmra.mxu1 %vm852_vm1, %v1553_v33 }
 0x287   : > { %v1554_v41 = vmax.f32 %v1460_v38, 0.0  ;;  %v1475_v42 = vadd.f32 %v2901_v40, %v3334_v51 }
 0x288   : > { %v1469_v44 = vpop.f32.mrf.mxu0 }
 0x289   : > { %v1470_v45 = vadd.f32 %v3334_v51, %v1469_v44  ;;  %2952 = vmatprep.mubr.msk.f32.mxu1 %vm852_vm1, %v1554_v41  ;;  %v1557_v46 = vmax.f32 %v1475_v42, 0.0 }
 0x28a   : > { %v2904_v47 = vpop.f32.mrf.mxu0  ;;  %2953 = vmatmul.mubr.msk.f32.gmra.mxu1 %vm852_vm1, %v1555_v39 }
 0x28b   : > { %v1556_v48 = vmax.f32 %v1470_v45, 0.0  ;;  %v1485_v49 = vadd.f32 %v2904_v47, %v3334_v51 }
 0x28c   : > { %v1479_v50 = vpop.f32.mrf.mxu0 }
 0x28d   : > { %v1480_v52 = vadd.f32 %v3334_v51, %v1479_v50  ;;  %2955 = vmatprep.mubr.msk.f32.mxu1 %vm852_vm1, %v1556_v48  ;;  %v1559_v53 = vmax.f32 %v1485_v49, 0.0 }
 0x28e   : > { %v2907_v54 = vpop.f32.mrf.mxu0  ;;  %2956 = vmatmul.mubr.msk.f32.gmra.mxu1 %vm852_vm1, %v1557_v46 }
 0x28f   : > { %v1558_v16 = vmax.f32 %v1480_v52, 0.0  ;;  %v1495_v55 = vadd.f32 %v2907_v54, %v3334_v51 }
 0x290   : > { %v1489_v56 = vpop.f32.mrf.mxu0 }
 0x291   : > { %v1490_v57 = vadd.f32 %v3334_v51, %v1489_v56  ;;  %2958 = vmatprep.mubr.msk.f32.mxu1 %vm852_vm1, %v1558_v16  ;;  %v1561_v58 = vmax.f32 %v1495_v55, 0.0 }
 0x292   : > { %v2910_v59 = vpop.f32.mrf.mxu0  ;;  %2959 = vmatmul.mubr.msk.f32.gmra.mxu1 %vm852_vm1, %v1559_v53 }
 0x293   : > { %v1560_v60 = vmax.f32 %v1490_v57, 0.0  ;;  %v1505_v61 = vadd.f32 %v2910_v59, %v3334_v51 }
 0x294   : > { %v1499_v62 = vpop.f32.mrf.mxu0 }
 0x295   : > { %v1500_v63 = vadd.f32 %v3334_v51, %v1499_v62  ;;  %2961 = vmatprep.mubr.msk.f32.mxu1 %vm852_vm1, %v1560_v60  ;;  %v1563_v0 = vmax.f32 %v1505_v61, 0.0 }
 0x296   : > { %v2913_v1 = vpop.f32.mrf.mxu0  ;;  %2962 = vmatmul.mubr.msk.f32.gmra.mxu1 %vm852_vm1, %v1561_v58 }
 0x297   : > { %v1562_v2 = vmax.f32 %v1500_v63, 0.0  ;;  %v1515_v3 = vadd.f32 %v2913_v1, %v3334_v51 }
 0x298   : > { %v1509_v4 = vpop.f32.mrf.mxu0 }
 0x299   : > { %v1510_v5 = vadd.f32 %v3334_v51, %v1509_v4  ;;  %2964 = vmatprep.mubr.msk.f32.mxu1 %vm852_vm1, %v1562_v2  ;;  %v1565_v6 = vmax.f32 %v1515_v3, 0.0 }
 0x29a   : > { %v2916_v7 = vpop.f32.mrf.mxu0  ;;  %2965 = vmatmul.mubr.msk.f32.gmra.mxu1 %vm852_vm1, %v1563_v0 }
 0x29b   : > { %v1564_v8 = vmax.f32 %v1510_v5, 0.0  ;;  %v1525_v9 = vadd.f32 %v2916_v7, %v3334_v51  ;;  %v2995_v5 = vmov 0  }
 0x29c   : > { %v1519_v10 = vpop.f32.mrf.mxu0  ;;  %2985 = vset.pattern.permute.xlu1 %v2995_v5  ;;  %2986 = vset.pattern.permute.xlu0 %v2995_v5 }
 0x29d   : > { %v1520_v11 = vadd.f32 %v3334_v51, %v1519_v10  ;;  %2967 = vmatprep.mubr.msk.f32.mxu1 %vm852_vm1, %v1564_v8  ;;  %v1567_v12 = vmax.f32 %v1525_v9, 0.0 }
 0x29e   : > { %v2919_v13 = vpop.f32.mrf.mxu0  ;;  %2968 = vmatmul.mubr.msk.f32.gmra.mxu1 %vm852_vm1, %v1565_v6 }
 0x29f   : > { %v1566_v14 = vmax.f32 %v1520_v11, 0.0  ;;  %v1535_v43 = vadd.f32 %v2919_v13, %v3334_v51 }
 0x2a0   : > { %v1529_v15 = vpop.f32.mrf.mxu0 }
 0x2a1   : > { %v1530_v17 = vadd.f32 %v3334_v51, %v1529_v15  ;;  %2970 = vmatprep.mubr.msk.f32.mxu1 %vm852_vm1, %v1566_v14  ;;  %v1569_v18 = vmax.f32 %v1535_v43, 0.0  ;;  %v3409_v51 = vld [vmem:[%s3665_s9] ss:$0 sm:$0xff] }
 0x2a2   : > { %2971 = vmatmul.mubr.msk.f32.gmra.mxu1 %vm852_vm1, %v1567_v12 }
 0x2a3   : > { %v1568_v19 = vmax.f32 %v1530_v17, 0.0 }
 0x2a5   : > { %2973 = vmatprep.mubr.msk.f32.mxu1 %vm852_vm1, %v1568_v19 }
 0x2a6   : > { %2974 = vmatmul.mubr.msk.f32.gmra.mxu1 %vm852_vm1, %v1569_v18 }
 0x32a   : > { %v2930_v21 = vpop.f32.mrf.mxu1 }
 0x32b   : > { %v1749_v22 = vadd.f32 %v2930_v21, %v3403_v20 }
 0x32c   : > { %v1743_v23 = vpop.f32.mrf.mxu1 }
 0x32d   : > { %v1903_v24 = vmax.f32 %v1749_v22, 0.0  ;;  %v1744_v25 = vadd.f32 %v3403_v20, %v1743_v23 }
 0x32e   : > { %v2933_v26 = vpop.f32.mrf.mxu1 }
 0x32f   : > { %v1902_v27 = vmax.f32 %v1744_v25, 0.0  ;;  %v1759_v28 = vadd.f32 %v2933_v26, %v3403_v20  ;;  %v1942_v29 = vmul.f32 %v3409_v51, %v1903_v24 }
 0x330   : > { %v1753_v30 = vpop.f32.mrf.mxu1 }
 0x331   : > { %v1905_v31 = vmax.f32 %v1759_v28, 0.0  ;;  %v1754_v32 = vadd.f32 %v3403_v20, %v1753_v30  ;;  %v1977_v33 = vsel %vm1973_vm2, %v1942_v29, 0.0  ;;  %v1941_v34 = vmul.f32 %v3409_v51, %v1902_v27 }
 0x332   : > { %1978 = vadd.xlane.f32.xlu0 %v1977_v33  ;;  %v2936_v35 = vpop.f32.mrf.mxu1 }
 0x333   : > { %v1904_v36 = vmax.f32 %v1754_v32, 0.0  ;;  %v1769_v37 = vadd.f32 %v2936_v35, %v3403_v20  ;;  %v1944_v38 = vmul.f32 %v3409_v51, %v1905_v31  ;;  %v1974_v40 = vsel %vm1973_vm2, %v1941_v34, 0.0 }
 0x334   : > { %v1763_v39 = vpop.f32.mrf.mxu1 }
 0x335   : > { %v1907_v41 = vmax.f32 %v1769_v37, 0.0  ;;  %v1764_v42 = vadd.f32 %v3403_v20, %v1763_v39  ;;  %v1983_v44 = vsel %vm1973_vm2, %v1944_v38, 0.0  ;;  %v1943_v45 = vmul.f32 %v3409_v51, %v1904_v36 }
 0x336   : > { %1984 = vadd.xlane.f32.xlu1 %v1983_v44  ;;  %v2939_v46 = vpop.f32.mrf.mxu1  ;;  %1975 = vadd.xlane.f32.xlu0 %v1974_v40 }
 0x337   : > { %v1906_v47 = vmax.f32 %v1764_v42, 0.0  ;;  %v1779_v48 = vadd.f32 %v2939_v46, %v3403_v20  ;;  %v1980_v50 = vsel %vm1973_vm2, %v1943_v45, 0.0  ;;  %v1946_v16 = vmul.f32 %v3409_v51, %v1907_v41 }
 0x338   : > { %v1773_v49 = vpop.f32.mrf.mxu1 }
 0x339   : > { %v1909_v52 = vmax.f32 %v1779_v48, 0.0  ;;  %v1774_v53 = vadd.f32 %v3403_v20, %v1773_v49  ;;  %v1945_v54 = vmul.f32 %v3409_v51, %v1906_v47  ;;  %v1989_v63 = vsel %vm1973_vm2, %v1946_v16, 0.0 }
 0x33a   : > { %v2942_v55 = vpop.f32.mrf.mxu1  ;;  %1981 = vadd.xlane.f32.xlu1 %v1980_v50 }
 0x33b   : > { %v1908_v56 = vmax.f32 %v1774_v53, 0.0  ;;  %v1789_v57 = vadd.f32 %v2942_v55, %v3403_v20  ;;  %v1986_v58 = vsel %vm1973_vm2, %v1945_v54, 0.0  ;;  %v1948_v60 = vmul.f32 %v3409_v51, %v1909_v52 }
 0x33c   : > { %v1783_v59 = vpop.f32.mrf.mxu1  ;;  %1987 = vadd.xlane.f32.xlu0 %v1986_v58 }
 0x33d   : > { %v1911_v61 = vmax.f32 %v1789_v57, 0.0  ;;  %v1784_v62 = vadd.f32 %v3403_v20, %v1783_v59  ;;  %v1947_v0 = vmul.f32 %v3409_v51, %v1908_v56  ;;  %v1995_v7 = vsel %vm1973_vm2, %v1948_v60, 0.0 }
 0x33e   : > { %v2945_v1 = vpop.f32.mrf.mxu1  ;;  %1990 = vadd.xlane.f32.xlu1 %v1989_v63 }
 0x33f   : > { %v1910_v2 = vmax.f32 %v1784_v62, 0.0  ;;  %v1799_v3 = vadd.f32 %v2945_v1, %v3403_v20  ;;  %v1992_v4 = vsel %vm1973_vm2, %v1947_v0, 0.0  ;;  %v1950_v11 = vmul.f32 %v3409_v51, %v1911_v61 }
 0x340   : > { %v1793_v6 = vpop.f32.mrf.mxu1  ;;  %1993 = vadd.xlane.f32.xlu0 %v1992_v4 }
 0x341   : > { %v1913_v8 = vmax.f32 %v1799_v3, 0.0  ;;  %v1794_v9 = vadd.f32 %v3403_v20, %v1793_v6  ;;  %v1949_v10 = vmul.f32 %v3409_v51, %v1910_v2  ;;  %v2001_v21 = vsel %vm1973_vm2, %v1950_v11, 0.0 }
 0x342   : > { %v2948_v12 = vpop.f32.mrf.mxu1  ;;  %1996 = vadd.xlane.f32.xlu1 %v1995_v7 }
 0x343   : > { %v1912_v13 = vmax.f32 %v1794_v9, 0.0  ;;  %v1809_v14 = vadd.f32 %v2948_v12, %v3403_v20  ;;  %v1998_v43 = vsel %vm1973_vm2, %v1949_v10, 0.0  ;;  %v1952_v17 = vmul.f32 %v3409_v51, %v1913_v8 }
 0x344   : > { %v1803_v15 = vpop.f32.mrf.mxu1  ;;  %1999 = vadd.xlane.f32.xlu0 %v1998_v43 }
 0x345   : > { %v1915_v18 = vmax.f32 %v1809_v14, 0.0  ;;  %v1804_v19 = vadd.f32 %v3403_v20, %v1803_v15  ;;  %v1951_v22 = vmul.f32 %v3409_v51, %v1912_v13  ;;  %v2007_v28 = vsel %vm1973_vm2, %v1952_v17, 0.0 }
 0x346   : > { %v2951_v23 = vpop.f32.mrf.mxu1  ;;  %2002 = vadd.xlane.f32.xlu1 %v2001_v21 }
 0x347   : > { %v1914_v24 = vmax.f32 %v1804_v19, 0.0  ;;  %v1819_v25 = vadd.f32 %v2951_v23, %v3403_v20  ;;  %v2004_v26 = vsel %vm1973_vm2, %v1951_v22, 0.0  ;;  %v1954_v32 = vmul.f32 %v3409_v51, %v1915_v18 }
 0x348   : > { %v1813_v27 = vpop.f32.mrf.mxu1  ;;  %2005 = vadd.xlane.f32.xlu0 %v2004_v26 }
 0x349   : > { %v1917_v29 = vmax.f32 %v1819_v25, 0.0  ;;  %v1814_v30 = vadd.f32 %v3403_v20, %v1813_v27  ;;  %v1953_v31 = vmul.f32 %v3409_v51, %v1914_v24  ;;  %v2013_v41 = vsel %vm1973_vm2, %v1954_v32, 0.0 }
 0x34a   : > { %v2954_v33 = vpop.f32.mrf.mxu1  ;;  %2008 = vadd.xlane.f32.xlu1 %v2007_v28 }
 0x34b   : > { %v1916_v34 = vmax.f32 %v1814_v30, 0.0  ;;  %v1829_v35 = vadd.f32 %v2954_v33, %v3403_v20  ;;  %v2010_v36 = vsel %vm1973_vm2, %v1953_v31, 0.0  ;;  %v1956_v38 = vmul.f32 %v3409_v51, %v1917_v29 }
 0x34c   : > { %v1823_v37 = vpop.f32.mrf.mxu1  ;;  %2011 = vadd.xlane.f32.xlu0 %v2010_v36 }
 0x34d   : > { %v1919_v39 = vmax.f32 %v1829_v35, 0.0  ;;  %v1824_v40 = vadd.f32 %v3403_v20, %v1823_v37  ;;  %v1955_v42 = vmul.f32 %v3409_v51, %v1916_v34  ;;  %v2019_v49 = vsel %vm1973_vm2, %v1956_v38, 0.0 }
 0x34e   : > { %v2957_v44 = vpop.f32.mrf.mxu1  ;;  %2014 = vadd.xlane.f32.xlu1 %v2013_v41 }
 0x34f   : > { %v1918_v45 = vmax.f32 %v1824_v40, 0.0  ;;  %v1839_v46 = vadd.f32 %v2957_v44, %v3403_v20  ;;  %v2016_v47 = vsel %vm1973_vm2, %v1955_v42, 0.0  ;;  %v1958_v54 = vmul.f32 %v3409_v51, %v1919_v39 }
 0x350   : > { %v1833_v48 = vpop.f32.mrf.mxu1  ;;  %2017 = vadd.xlane.f32.xlu0 %v2016_v47 }
 0x351   : > { %v1921_v50 = vmax.f32 %v1839_v46, 0.0  ;;  %v1834_v52 = vadd.f32 %v3403_v20, %v1833_v48  ;;  %v1957_v53 = vmul.f32 %v3409_v51, %v1918_v45  ;;  %v2025_v62 = vsel %vm1973_vm2, %v1958_v54, 0.0 }
 0x352   : > { %v2960_v16 = vpop.f32.mrf.mxu1  ;;  %2020 = vadd.xlane.f32.xlu1 %v2019_v49 }
 0x353   : > { %v1920_v55 = vmax.f32 %v1834_v52, 0.0  ;;  %v1849_v56 = vadd.f32 %v2960_v16, %v3403_v20  ;;  %v2022_v57 = vsel %vm1973_vm2, %v1957_v53, 0.0  ;;  %v1960_v59 = vmul.f32 %v3409_v51, %v1921_v50 }
 0x354   : > { %v1843_v58 = vpop.f32.mrf.mxu1  ;;  %2023 = vadd.xlane.f32.xlu0 %v2022_v57 }
 0x355   : > { %v1923_v60 = vmax.f32 %v1849_v56, 0.0  ;;  %v1844_v61 = vadd.f32 %v3403_v20, %v1843_v58  ;;  %v1959_v63 = vmul.f32 %v3409_v51, %v1920_v55  ;;  %v2031_v5 = vsel %vm1973_vm2, %v1960_v59, 0.0  ;;  %v3506_v58 = vld [vmem:[#allocation2] ss:$0 sm:$0xff] }
 0x356   : > { %v2963_v0 = vpop.f32.mrf.mxu1  ;;  %2026 = vadd.xlane.f32.xlu1 %v2025_v62 }
 0x357   : > { %v1922_v1 = vmax.f32 %v1844_v61, 0.0  ;;  %v1859_v2 = vadd.f32 %v2963_v0, %v3403_v20  ;;  %v2028_v3 = vsel %vm1973_vm2, %v1959_v63, 0.0  ;;  %v1962_v9 = vmul.f32 %v3409_v51, %v1923_v60 }
 0x358   : > { %v1853_v4 = vpop.f32.mrf.mxu1  ;;  %2029 = vadd.xlane.f32.xlu0 %v2028_v3 }
 0x359   : > { %v1925_v6 = vmax.f32 %v1859_v2, 0.0  ;;  %v1854_v7 = vadd.f32 %v3403_v20, %v1853_v4  ;;  %v1961_v8 = vmul.f32 %v3409_v51, %v1922_v1  ;;  %v2037_v18 = vsel %vm1973_vm2, %v1962_v9, 0.0 }
 0x35a   : > { %v2966_v10 = vpop.f32.mrf.mxu1  ;;  %2032 = vadd.xlane.f32.xlu1 %v2031_v5 }
 0x35b   : > { %v1924_v11 = vmax.f32 %v1854_v7, 0.0  ;;  %v1869_v12 = vadd.f32 %v2966_v10, %v3403_v20  ;;  %v2034_v13 = vsel %vm1973_vm2, %v1961_v8, 0.0  ;;  %v1964_v43 = vmul.f32 %v3409_v51, %v1925_v6 }
 0x35c   : > { %v1863_v14 = vpop.f32.mrf.mxu1  ;;  %2035 = vadd.xlane.f32.xlu0 %v2034_v13 }
 0x35d   : > { %v1927_v15 = vmax.f32 %v1869_v12, 0.0  ;;  %v1864_v17 = vadd.f32 %v3403_v20, %v1863_v14  ;;  %v1963_v19 = vmul.f32 %v3409_v51, %v1924_v11  ;;  %v2043_v26 = vsel %vm1973_vm2, %v1964_v43, 0.0 }
 0x35e   : > { %v2969_v21 = vpop.f32.mrf.mxu1  ;;  %2038 = vadd.xlane.f32.xlu1 %v2037_v18 }
 0x35f   : > { %v1926_v22 = vmax.f32 %v1864_v17, 0.0  ;;  %v1879_v23 = vadd.f32 %v2969_v21, %v3403_v20  ;;  %v2040_v24 = vsel %vm1973_vm2, %v1963_v19, 0.0  ;;  %v1966_v30 = vmul.f32 %v3409_v51, %v1927_v15 }
 0x360   : > { %v1873_v25 = vpop.f32.mrf.mxu1  ;;  %2041 = vadd.xlane.f32.xlu0 %v2040_v24 }
 0x361   : > { %v1929_v27 = vmax.f32 %v1879_v23, 0.0  ;;  %v1874_v28 = vadd.f32 %v3403_v20, %v1873_v25  ;;  %v1965_v29 = vmul.f32 %v3409_v51, %v1926_v22  ;;  %v2049_v39 = vsel %vm1973_vm2, %v1966_v30, 0.0 }
 0x362   : > { %v2972_v31 = vpop.f32.mrf.mxu1  ;;  %2044 = vadd.xlane.f32.xlu1 %v2043_v26 }
 0x363   : > { %v1928_v32 = vmax.f32 %v1874_v28, 0.0  ;;  %v1889_v33 = vadd.f32 %v2972_v31, %v3403_v20  ;;  %v2046_v34 = vsel %vm1973_vm2, %v1965_v29, 0.0  ;;  %v1968_v36 = vmul.f32 %v3409_v51, %v1929_v27 }
 0x364   : > { %v1883_v35 = vpop.f32.mrf.mxu1  ;;  %2047 = vadd.xlane.f32.xlu0 %v2046_v34 }
 0x365   : > { %v1931_v37 = vmax.f32 %v1889_v33, 0.0  ;;  %v1884_v38 = vadd.f32 %v3403_v20, %v1883_v35  ;;  %v1967_v40 = vmul.f32 %v3409_v51, %v1928_v32  ;;  %v2055_v47 = vsel %vm1973_vm2, %v1968_v36, 0.0 }
 0x366   : > { %v2975_v41 = vpop.f32.mrf.mxu1  ;;  %2050 = vadd.xlane.f32.xlu1 %v2049_v39 }
 0x367   : > { %v1930_v42 = vmax.f32 %v1884_v38, 0.0  ;;  %v1899_v44 = vadd.f32 %v2975_v41, %v3403_v20  ;;  %v2052_v45 = vsel %vm1973_vm2, %v1967_v40, 0.0  ;;  %v1970_v52 = vmul.f32 %v3409_v51, %v1931_v37 }
 0x368   : > { %v1893_v46 = vpop.f32.mrf.mxu1  ;;  %2053 = vadd.xlane.f32.xlu0 %v2052_v45 }
 0x369   : > { %v1933_v48 = vmax.f32 %v1899_v44, 0.0  ;;  %v1894_v49 = vadd.f32 %v3403_v20, %v1893_v46  ;;  %v1969_v50 = vmul.f32 %v3409_v51, %v1930_v42  ;;  %v2061_v55 = vsel %vm1973_vm2, %v1970_v52, 0.0 }
 0x36a   : > { %2056 = vadd.xlane.f32.xlu1 %v2055_v47 }
 0x36b   : > { %v1932_v53 = vmax.f32 %v1894_v49, 0.0  ;;  %v2058_v54 = vsel %vm1973_vm2, %v1969_v50, 0.0  ;;  %v1972_v16 = vmul.f32 %v3409_v51, %v1933_v48 }
 0x36c   : > { %2059 = vadd.xlane.f32.xlu0 %v2058_v54 }
 0x36d   : > { %v1971_v56 = vmul.f32 %v3409_v51, %v1932_v53  ;;  %v2067_v57 = vsel %vm1973_vm2, %v1972_v16, 0.0 }
 0x36e   : > { %2062 = vadd.xlane.f32.xlu1 %v2061_v55 }
 0x36f   : > { %v2064_v20 = vsel %vm1973_vm2, %v1971_v56, 0.0 }
 0x370   : > { %2065 = vadd.xlane.f32.xlu0 %v2064_v20 }
 0x372   : > { %2068 = vadd.xlane.f32.xlu1 %v2067_v57 }
 0x3bb   : > { %v1979_v59 = vpop.xlane.xlu0 %1978 }
 0x3bc   : > { %v2078_v60 = vadd.f32 %v3506_v58, %v1979_v59 }
 0x3be   : > { %v2110_v61 = vmax.f32 %v2078_v60, 0.0 }
 0x3bf   : > { %v1985_v62 = vpop.xlane.xlu1 %1984  ;;  %v1976_v63 = vpop.xlane.xlu0 %1975 }
 0x3c0   : > { %v2080_v0 = vadd.f32 %v3506_v58, %v1985_v62  ;;  %v2077_v1 = vadd.f32 %v3506_v58, %v1976_v63  ;;  %2149 = vperm.xlu1 %2985, %v2110_v61  }
 0x3c2   : > { %v2112_v51 = vmax.f32 %v2080_v0, 0.0  ;;  %v2109_v2 = vmax.f32 %v2077_v1, 0.0 }
 0x3c3   : > { %v1982_v3 = vpop.xlane.xlu1 %1981 }
 0x3c4   : > { %v2079_v4 = vadd.f32 %v3506_v58, %v1982_v3  ;;  %2159 = vperm.xlu1 %2985, %v2112_v51   ;;  %2144 = vperm.xlu0 %2986, %v2109_v2  }
 0x3c5   : > { %v1988_v5 = vpop.xlane.xlu0 %1987 }
 0x3c6   : > { %v2111_v6 = vmax.f32 %v2079_v4, 0.0  ;;  %v2081_v10 = vadd.f32 %v3506_v58, %v1988_v5 }
 0x3c7   : > { %v1991_v7 = vpop.xlane.xlu1 %1990 }
 0x3c8   : > { %v2082_v8 = vadd.f32 %v3506_v58, %v1991_v7  ;;  %2154 = vperm.xlu1 %2985, %v2111_v6   ;;  %v2113_v14 = vmax.f32 %v2081_v10, 0.0 }
 0x3c9   : > { %v1994_v9 = vpop.xlane.xlu0 %1993 }
 0x3ca   : > { %v2114_v11 = vmax.f32 %v2082_v8, 0.0  ;;  %v2083_v19 = vadd.f32 %v3506_v58, %v1994_v9 }
 0x3cb   : > { %v1997_v12 = vpop.xlane.xlu1 %1996 }
 0x3cc   : > { %2169 = vperm.xlu1 %2985, %v2114_v11   ;;  %v2084_v43 = vadd.f32 %v3506_v58, %v1997_v12  ;;  %v2115_v26 = vmax.f32 %v2083_v19, 0.0 }
 0x3cd   : > { %v2000_v13 = vpop.xlane.xlu0 %1999 }
 0x3ce   : > { %v2116_v21 = vmax.f32 %v2084_v43, 0.0  ;;  %v2085_v27 = vadd.f32 %v3506_v58, %v2000_v13 }
 0x3cf   : > { %v2003_v15 = vpop.xlane.xlu1 %2002 }
 0x3d0   : > { %v2086_v17 = vadd.f32 %v3506_v58, %v2003_v15  ;;  %2164 = vperm.xlu1 %2985, %v2113_v14   ;;  %v2117_v32 = vmax.f32 %v2085_v27, 0.0 }
 0x3d1   : > { %v2006_v18 = vpop.xlane.xlu0 %2005 }
 0x3d2   : > { %v2118_v22 = vmax.f32 %v2086_v17, 0.0  ;;  %v2087_v33 = vadd.f32 %v3506_v58, %v2006_v18 }
 0x3d3   : > { %v2009_v23 = vpop.xlane.xlu1 %2008 }
 0x3d4   : > { %v2088_v24 = vadd.f32 %v3506_v58, %v2009_v23  ;;  %2189 = vperm.xlu0 %2986, %v2118_v22   ;;  %2179 = vperm.xlu1 %2985, %v2116_v21   ;;  %v2119_v38 = vmax.f32 %v2087_v33, 0.0 }
 0x3d5   : > { %v2012_v25 = vpop.xlane.xlu0 %2011 }
 0x3d6   : > { %v2120_v28 = vmax.f32 %v2088_v24, 0.0  ;;  %v2089_v39 = vadd.f32 %v3506_v58, %v2012_v25 }
 0x3d7   : > { %v2015_v29 = vpop.xlane.xlu1 %2014 }
 0x3d8   : > { %v2090_v30 = vadd.f32 %v3506_v58, %v2015_v29  ;;  %2199 = vperm.xlu0 %2986, %v2120_v28   ;;  %2174 = vperm.xlu1 %2985, %v2115_v26   ;;  %v2121_v45 = vmax.f32 %v2089_v39, 0.0  ;;  %v3543_v28 = vld [vmem:[%s3667_s11] ss:$0 sm:$0xff] }
 0x3d9   : > { %v2018_v31 = vpop.xlane.xlu0 %2017  ;;  %v3548_v29 = vld [vmem:[%s3668_s12] ss:$0 sm:$0xff] }
 0x3da   : > { %v2122_v34 = vmax.f32 %v2090_v30, 0.0  ;;  %v2091_v46 = vadd.f32 %v3506_v58, %v2018_v31 }
 0x3db   : > { %v2021_v35 = vpop.xlane.xlu1 %2020 }
 0x3dc   : > { %v2092_v36 = vadd.f32 %v3506_v58, %v2021_v35  ;;  %2209 = vperm.xlu0 %2986, %v2122_v34   ;;  %2184 = vperm.xlu1 %2985, %v2117_v32   ;;  %v2123_v52 = vmax.f32 %v2091_v46, 0.0 }
 0x3dd   : > { %v2024_v37 = vpop.xlane.xlu0 %2023 }
 0x3de   : > { %v2124_v40 = vmax.f32 %v2092_v36, 0.0  ;;  %v2093_v53 = vadd.f32 %v3506_v58, %v2024_v37 }
 0x3df   : > { %v2027_v41 = vpop.xlane.xlu1 %2026 }
 0x3e0   : > { %v2094_v42 = vadd.f32 %v3506_v58, %v2027_v41  ;;  %2219 = vperm.xlu0 %2986, %v2124_v40   ;;  %2194 = vperm.xlu1 %2985, %v2119_v38   ;;  %v2125_v57 = vmax.f32 %v2093_v53, 0.0 }
 0x3e1   : > { %v2030_v44 = vpop.xlane.xlu0 %2029 }
 0x3e2   : > { %v2126_v47 = vmax.f32 %v2094_v42, 0.0  ;;  %v2095_v20 = vadd.f32 %v3506_v58, %v2030_v44 }
 0x3e3   : > { %v2033_v48 = vpop.xlane.xlu1 %2032 }
 0x3e4   : > { %v2096_v49 = vadd.f32 %v3506_v58, %v2033_v48  ;;  %2229 = vperm.xlu0 %2986, %v2126_v47   ;;  %2204 = vperm.xlu1 %2985, %v2121_v45   ;;  %v2127_v63 = vmax.f32 %v2095_v20, 0.0 }
 0x3e5   : > { %v2036_v50 = vpop.xlane.xlu0 %2035 }
 0x3e6   : > { %v2128_v54 = vmax.f32 %v2096_v49, 0.0  ;;  %v2097_v0 = vadd.f32 %v3506_v58, %v2036_v50 }
 0x3e7   : > { %v2039_v16 = vpop.xlane.xlu1 %2038 }
 0x3e8   : > { %v2098_v55 = vadd.f32 %v3506_v58, %v2039_v16  ;;  %2239 = vperm.xlu0 %2986, %v2128_v54   ;;  %2214 = vperm.xlu1 %2985, %v2123_v52   ;;  %v2129_v3 = vmax.f32 %v2097_v0, 0.0 }
 0x3e9   : > { %v2042_v56 = vpop.xlane.xlu0 %2041 }
 0x3ea   : > { %v2130_v59 = vmax.f32 %v2098_v55, 0.0  ;;  %v2099_v4 = vadd.f32 %v3506_v58, %v2042_v56 }
 0x3eb   : > { %v2045_v60 = vpop.xlane.xlu1 %2044 }
 0x3ec   : > { %v2100_v61 = vadd.f32 %v3506_v58, %v2045_v60  ;;  %2249 = vperm.xlu0 %2986, %v2130_v59   ;;  %2224 = vperm.xlu1 %2985, %v2125_v57   ;;  %v2131_v9 = vmax.f32 %v2099_v4, 0.0 }
 0x3ed   : > { %v2048_v62 = vpop.xlane.xlu0 %2047 }
 0x3ee   : > { %v2132_v1 = vmax.f32 %v2100_v61, 0.0  ;;  %v2101_v10 = vadd.f32 %v3506_v58, %v2048_v62 }
 0x3ef   : > { %v2051_v51 = vpop.xlane.xlu1 %2050 }
 0x3f0   : > { %v2102_v2 = vadd.f32 %v3506_v58, %v2051_v51  ;;  %2259 = vperm.xlu0 %2986, %v2132_v1   ;;  %2234 = vperm.xlu1 %2985, %v2127_v63   ;;  %v2133_v43 = vmax.f32 %v2101_v10, 0.0 }
 0x3f1   : > { %v2054_v6 = vpop.xlane.xlu0 %2053 }
 0x3f2   : > { %v2134_v5 = vmax.f32 %v2102_v2, 0.0  ;;  %v2103_v15 = vadd.f32 %v3506_v58, %v2054_v6 }
 0x3f3   : > { %v2057_v7 = vpop.xlane.xlu1 %2056 }
 0x3f4   : > { %v2104_v8 = vadd.f32 %v3506_v58, %v2057_v7  ;;  %2269 = vperm.xlu0 %2986, %v2134_v5   ;;  %2244 = vperm.xlu1 %2985, %v2129_v3   ;;  %v2135_v21 = vmax.f32 %v2103_v15, 0.0 }
 0x3f5   : > { %v2060_v14 = vpop.xlane.xlu0 %2059 }
 0x3f6   : > { %v2136_v11 = vmax.f32 %v2104_v8, 0.0  ;;  %v2105_v22 = vadd.f32 %v3506_v58, %v2060_v14 }
 0x3f7   : > { %v2063_v12 = vpop.xlane.xlu1 %2062 }
 0x3f8   : > { %v2106_v13 = vadd.f32 %v3506_v58, %v2063_v12  ;;  %2279 = vperm.xlu0 %2986, %v2136_v11   ;;  %2254 = vperm.xlu1 %2985, %v2131_v9   ;;  %v2137_v25 = vmax.f32 %v2105_v22, 0.0 }
 0x3f9   : > { %v2066_v24 = vpop.xlane.xlu0 %2065 }
 0x3fa   : > { %v2138_v17 = vmax.f32 %v2106_v13, 0.0  ;;  %v2107_v26 = vadd.f32 %v3506_v58, %v2066_v24 }
 0x3fb   : > { %v2069_v18 = vpop.xlane.xlu1 %2068 }
 0x3fc   : > { %v2108_v19 = vadd.f32 %v3506_v58, %v2069_v18  ;;  %2289 = vperm.xlu0 %2986, %v2138_v17   ;;  %2264 = vperm.xlu1 %2985, %v2133_v43   ;;  %v2139_v27 = vmax.f32 %v2107_v26, 0.0 }
 0x3fe   : > { %v2140_v23 = vmax.f32 %v2108_v19, 0.0 }
 0x400   : > { %2299 = vperm.xlu0 %2986, %v2140_v23   ;;  %2274 = vperm.xlu1 %2985, %v2135_v21  }
 0x404   : > { %2284 = vperm.xlu1 %2985, %v2137_v25  }
 0x408   : > { %2294 = vperm.xlu1 %2985, %v2139_v27  }
 0x43b   : > { %v2150_v30 = vpop.permute.xlu1 %2149 }
 0x43c   : > { %v2309_v31 = vmul.f32 %v3543_v28, %v2150_v30 }
 0x43e   : > { %v2348_v58 = vadd.f32 %v3548_v29, %v2309_v31 }
 0x43f   : > { %v2160_v32 = vpop.permute.xlu1 %2159  ;;  %v2145_v33 = vpop.permute.xlu0 %2144 }
 0x440   : > { %2380 = vst [vmem:[%s3556_s10 + $0x8] sm:$0xff] %v2348_v58  ;;  %v2311_v34 = vmul.f32 %v3543_v28, %v2160_v32  ;;  %v2308_v35 = vmul.f32 %v3543_v28, %v2145_v33 }
 0x442   : > { %v2350_v36 = vadd.f32 %v3548_v29, %v2311_v34  ;;  %v2347_v37 = vadd.f32 %v3548_v29, %v2308_v35 }
 0x443   : > { %v2155_v38 = vpop.permute.xlu1 %2154 }
 0x444   : > { %2382 = vst [vmem:[%s3556_s10 + $0x18] sm:$0xff] %v2350_v36  ;;  %2379 = vst [vmem:[%s3556_s10] sm:$0xff] %v2347_v37  ;;  %v2310_v39 = vmul.f32 %v3543_v28, %v2155_v38 }
 0x446   : > { %v2349_v40 = vadd.f32 %v3548_v29, %v2310_v39 }
 0x447   : > { %v2170_v41 = vpop.permute.xlu1 %2169 }
 0x448   : > { %2381 = vst [vmem:[%s3556_s10 + $0x10] sm:$0xff] %v2349_v40  ;;  %v2313_v42 = vmul.f32 %v3543_v28, %v2170_v41 }
 0x44a   : > { %v2352_v44 = vadd.f32 %v3548_v29, %v2313_v42 }
 0x44b   : > { %v2165_v45 = vpop.permute.xlu1 %2164 }
 0x44c   : > { %2384 = vst [vmem:[%s3556_s10 + $0x28] sm:$0xff] %v2352_v44  ;;  %v2312_v46 = vmul.f32 %v3543_v28, %v2165_v45 }
 0x44e   : > { %v2351_v47 = vadd.f32 %v3548_v29, %v2312_v46 }
 0x44f   : > { %v2180_v48 = vpop.permute.xlu1 %2179  ;;  %v2190_v49 = vpop.permute.xlu0 %2189 }
 0x450   : > { %2383 = vst [vmem:[%s3556_s10 + $0x20] sm:$0xff] %v2351_v47  ;;  %v2315_v50 = vmul.f32 %v3543_v28, %v2180_v48  ;;  %v2317_v52 = vmul.f32 %v3543_v28, %v2190_v49 }
 0x452   : > { %v2354_v53 = vadd.f32 %v3548_v29, %v2315_v50  ;;  %v2356_v54 = vadd.f32 %v3548_v29, %v2317_v52 }
 0x453   : > { %v2175_v16 = vpop.permute.xlu1 %2174  ;;  %v2200_v55 = vpop.permute.xlu0 %2199 }
 0x454   : > { %2386 = vst [vmem:[%s3556_s10 + $0x38] sm:$0xff] %v2354_v53  ;;  %2388 = vst [vmem:[%s3556_s10 + $0x48] sm:$0xff] %v2356_v54  ;;  %v2314_v56 = vmul.f32 %v3543_v28, %v2175_v16  ;;  %v2319_v57 = vmul.f32 %v3543_v28, %v2200_v55 }
 0x456   : > { %v2353_v20 = vadd.f32 %v3548_v29, %v2314_v56  ;;  %v2358_v59 = vadd.f32 %v3548_v29, %v2319_v57 }
 0x457   : > { %v2185_v60 = vpop.permute.xlu1 %2184  ;;  %v2210_v61 = vpop.permute.xlu0 %2209 }
 0x458   : > { %2385 = vst [vmem:[%s3556_s10 + $0x30] sm:$0xff] %v2353_v20  ;;  %2390 = vst [vmem:[%s3556_s10 + $0x58] sm:$0xff] %v2358_v59  ;;  %v2316_v62 = vmul.f32 %v3543_v28, %v2185_v60  ;;  %v2321_v63 = vmul.f32 %v3543_v28, %v2210_v61 }
 0x45a   : > { %v2355_v0 = vadd.f32 %v3548_v29, %v2316_v62  ;;  %v2360_v1 = vadd.f32 %v3548_v29, %v2321_v63 }
 0x45b   : > { %v2195_v51 = vpop.permute.xlu1 %2194  ;;  %v2220_v2 = vpop.permute.xlu0 %2219 }
 0x45c   : > { %2387 = vst [vmem:[%s3556_s10 + $0x40] sm:$0xff] %v2355_v0  ;;  %2392 = vst [vmem:[%s3556_s10 + $0x68] sm:$0xff] %v2360_v1  ;;  %v2318_v3 = vmul.f32 %v3543_v28, %v2195_v51  ;;  %v2323_v4 = vmul.f32 %v3543_v28, %v2220_v2 }
 0x45e   : > { %v2357_v5 = vadd.f32 %v3548_v29, %v2318_v3  ;;  %v2362_v6 = vadd.f32 %v3548_v29, %v2323_v4 }
 0x45f   : > { %v2205_v7 = vpop.permute.xlu1 %2204  ;;  %v2230_v8 = vpop.permute.xlu0 %2229 }
 0x460   : > { %2389 = vst [vmem:[%s3556_s10 + $0x50] sm:$0xff] %v2357_v5  ;;  %2394 = vst [vmem:[%s3556_s10 + $0x78] sm:$0xff] %v2362_v6  ;;  %v2320_v9 = vmul.f32 %v3543_v28, %v2205_v7  ;;  %v2325_v10 = vmul.f32 %v3543_v28, %v2230_v8 }
 0x462   : > { %v2359_v11 = vadd.f32 %v3548_v29, %v2320_v9  ;;  %v2364_v12 = vadd.f32 %v3548_v29, %v2325_v10 }
 0x463   : > { %v2215_v13 = vpop.permute.xlu1 %2214  ;;  %v2240_v14 = vpop.permute.xlu0 %2239 }
 0x464   : > { %2391 = vst [vmem:[%s3556_s10 + $0x60] sm:$0xff] %v2359_v11  ;;  %2396 = vst [vmem:[%s3556_s10 + $0x88] sm:$0xff] %v2364_v12  ;;  %v2322_v43 = vmul.f32 %v3543_v28, %v2215_v13  ;;  %v2327_v15 = vmul.f32 %v3543_v28, %v2240_v14 }
 0x466   : > { %v2361_v17 = vadd.f32 %v3548_v29, %v2322_v43  ;;  %v2366_v18 = vadd.f32 %v3548_v29, %v2327_v15 }
 0x467   : > { %v2225_v19 = vpop.permute.xlu1 %2224  ;;  %v2250_v21 = vpop.permute.xlu0 %2249 }
 0x468   : > { %2393 = vst [vmem:[%s3556_s10 + $0x70] sm:$0xff] %v2361_v17  ;;  %2398 = vst [vmem:[%s3556_s10 + $0x98] sm:$0xff] %v2366_v18  ;;  %v2324_v22 = vmul.f32 %v3543_v28, %v2225_v19  ;;  %v2329_v23 = vmul.f32 %v3543_v28, %v2250_v21 }
 0x46a   : > { %v2363_v24 = vadd.f32 %v3548_v29, %v2324_v22  ;;  %v2368_v25 = vadd.f32 %v3548_v29, %v2329_v23 }
 0x46b   : > { %v2235_v26 = vpop.permute.xlu1 %2234  ;;  %v2260_v27 = vpop.permute.xlu0 %2259 }
 0x46c   : > { %2395 = vst [vmem:[%s3556_s10 + $0x80] sm:$0xff] %v2363_v24  ;;  %2400 = vst [vmem:[%s3556_s10 + $0xa8] sm:$0xff] %v2368_v25  ;;  %v2326_v30 = vmul.f32 %v3543_v28, %v2235_v26  ;;  %v2331_v31 = vmul.f32 %v3543_v28, %v2260_v27 }
 0x46e   : > { %v2365_v58 = vadd.f32 %v3548_v29, %v2326_v30  ;;  %v2370_v32 = vadd.f32 %v3548_v29, %v2331_v31 }
 0x46f   : > { %v2245_v33 = vpop.permute.xlu1 %2244  ;;  %v2270_v34 = vpop.permute.xlu0 %2269 }
 0x470   : > { %2397 = vst [vmem:[%s3556_s10 + $0x90] sm:$0xff] %v2365_v58  ;;  %2402 = vst [vmem:[%s3556_s10 + $0xb8] sm:$0xff] %v2370_v32  ;;  %v2328_v35 = vmul.f32 %v3543_v28, %v2245_v33  ;;  %v2333_v36 = vmul.f32 %v3543_v28, %v2270_v34 }
 0x472   : > { %v2367_v37 = vadd.f32 %v3548_v29, %v2328_v35  ;;  %v2372_v38 = vadd.f32 %v3548_v29, %v2333_v36 }
 0x473   : > { %v2255_v39 = vpop.permute.xlu1 %2254  ;;  %v2280_v40 = vpop.permute.xlu0 %2279 }
 0x474   : > { %2399 = vst [vmem:[%s3556_s10 + $0xa0] sm:$0xff] %v2367_v37  ;;  %2404 = vst [vmem:[%s3556_s10 + $0xc8] sm:$0xff] %v2372_v38  ;;  %v2330_v41 = vmul.f32 %v3543_v28, %v2255_v39  ;;  %v2335_v42 = vmul.f32 %v3543_v28, %v2280_v40 }
 0x476   : > { %v2369_v44 = vadd.f32 %v3548_v29, %v2330_v41  ;;  %v2374_v45 = vadd.f32 %v3548_v29, %v2335_v42 }
 0x477   : > { %v2265_v46 = vpop.permute.xlu1 %2264  ;;  %v2290_v47 = vpop.permute.xlu0 %2289 }
 0x478   : > { %2401 = vst [vmem:[%s3556_s10 + $0xb0] sm:$0xff] %v2369_v44  ;;  %2406 = vst [vmem:[%s3556_s10 + $0xd8] sm:$0xff] %v2374_v45  ;;  %v2332_v48 = vmul.f32 %v3543_v28, %v2265_v46  ;;  %v2337_v49 = vmul.f32 %v3543_v28, %v2290_v47 }
 0x47a   : > { %v2371_v50 = vadd.f32 %v3548_v29, %v2332_v48  ;;  %v2376_v52 = vadd.f32 %v3548_v29, %v2337_v49 }
 0x47b   : > { %v2275_v53 = vpop.permute.xlu1 %2274  ;;  %v2300_v54 = vpop.permute.xlu0 %2299 }
 0x47c   : > { %2403 = vst [vmem:[%s3556_s10 + $0xc0] sm:$0xff] %v2371_v50  ;;  %2408 = vst [vmem:[%s3556_s10 + $0xe8] sm:$0xff] %v2376_v52  ;;  %v2334_v16 = vmul.f32 %v3543_v28, %v2275_v53  ;;  %v2339_v55 = vmul.f32 %v3543_v28, %v2300_v54 }
 0x47e   : > { %v2373_v56 = vadd.f32 %v3548_v29, %v2334_v16  ;;  %v2378_v57 = vadd.f32 %v3548_v29, %v2339_v55 }
 0x47f   : > { %v2285_v20 = vpop.permute.xlu1 %2284 }
 0x480   : > { %2405 = vst [vmem:[%s3556_s10 + $0xd0] sm:$0xff] %v2373_v56  ;;  %2410 = vst [vmem:[%s3556_s10 + $0xf8] sm:$0xff] %v2378_v57  ;;  %v2336_v59 = vmul.f32 %v3543_v28, %v2285_v20 }
 0x482   : > { %v2375_v60 = vadd.f32 %v3548_v29, %v2336_v59 }
 0x483   : > { %v2295_v61 = vpop.permute.xlu1 %2294 }
 0x484   : > { %2407 = vst [vmem:[%s3556_s10 + $0xe0] sm:$0xff] %v2375_v60  ;;  %v2338_v62 = vmul.f32 %v3543_v28, %v2295_v61 }
 0x486   : > { %v2377_v63 = vadd.f32 %v3548_v29, %v2338_v62 }
 0x488   : > { %2409 = vst [vmem:[%s3556_s10 + $0xf0] sm:$0xff] %v2377_v63 }
 0x489 PF: > { %s25_s27 = sadd.s32 1, %s2993_s27  }
 0x48a   : > { %p22_p4 = scmp.ge.s32.totalorder %s25_s27, 4  }
 0x48c   :  { %24 = sbr.rel (!%p22_p4) target bundleno = 3 (0x3), region = 102 }

</bundles_post_ra>
